<compile_context>
chip_gen: v7x
topology: tpu7x:2x2x1
jax: 0.10.0
libtpu: 0.0.40
codegen_flags: <defaults>
</compile_context>

<pallas_src>
import functools

import jax
import jax.numpy as jnp
from jax.experimental import pallas as pl
from jax.experimental.pallas import tpu as pltpu

BN_EPS = 1e-5
LANES = 128


def _vmem_capacity_bytes():
    try:
        info = pltpu.get_tpu_info()
        return int(getattr(info, "vmem_capacity_bytes", 64 * 1024 * 1024))
    except Exception:
        return 64 * 1024 * 1024


def _round_up(x, m):
    return ((x + m - 1) // m) * m


def _sublane(dtype):
    return 16 if jnp.dtype(dtype).itemsize == 2 else 8


def _choose_h_tile(h_out, w_out, hp, wp, c_in, k2c_pad, c_out_pad,
                   compute_dtype, conv_dtype, budget, max_rows):
    """Largest divisor of h_out whose pass-1 working set fits the VMEM budget."""
    cb = jnp.dtype(compute_dtype).itemsize
    ob = jnp.dtype(conv_dtype).itemsize
    sub = max(_sublane(compute_dtype), _sublane(conv_dtype))
    # input block + weight block are double-buffered by the pipeline.
    fixed = 2 * hp * wp * c_in * cb + 2 * k2c_pad * c_out_pad * cb

    def est(th):
        rows = th * w_out
        return fixed + rows * k2c_pad * cb + 2 * rows * c_out_pad * ob

    cands = [t for t in range(h_out, 0, -1)
             if h_out % t == 0 and (t * w_out) % sub == 0]
    if not cands:
        return h_out  # TODO(synk): odd Hout*Wout needs row padding of conv_flat.
    for t in cands:
        if t * w_out <= max_rows and est(t) <= budget:
            return t
    return cands[-1]


def _choose_row_tile(rows_total, c_out_pad, in_dtype, budget, target):
    if rows_total <= target:
        return rows_total                      # full dim -> always a legal block
    sub = _sublane(in_dtype)
    tr = max(sub, (target // sub) * sub)
    per_row = c_out_pad * (jnp.dtype(in_dtype).itemsize + 4)  # in + f32 out
    while tr > sub and 2 * tr * per_row > budget:
        tr = max(sub, (tr // 2 // sub) * sub)
    return tr


def _conv_stats_kernel(xp_ref, w_ref, conv_ref, stats_ref, slab_ref, *,
                       th, w_out, c_in, kh, kw, dilation, k2c, k2c_pad):
    # xp_ref   : (1, Hp, Wp, Cin)        padded NHWC input, resident per batch elt
    # w_ref    : (k2c_pad, Cout_pad)     flattened HWIO weight (zero-padded)
    # conv_ref : (rows_tile, Cout_pad)   raw conv tile (lane-dense store)
    # stats_ref: (1, 2, Cout_pad)        per-tile [sum, sum_sq] (f32)
    # slab_ref : (rows_tile, k2c_pad)    2-D im2col scratch (no full-slab reshape)
    rows = th * w_out
    row0 = pl.multiple_of(pl.program_id(1) * th, th)

    if k2c_pad > k2c:
        # Keep the lane-padding tail zero so the zero-padded weight rows
        # contribute exactly 0 to the matmul (uninitialised VMEM could be NaN).
        slab_ref[:, k2c:] = jnp.zeros((rows, k2c_pad - k2c), slab_ref.dtype)

    # ---- im2col: one Cin-wide column group per kernel tap, sliced from the
    #      input ref for this Hout tile (input is already in compute dtype).
    for i in range(kh):
        for j in range(kw):
            tap = i * kw + j
            win = xp_ref[0, pl.ds(row0 + i * dilation, th),
                         pl.ds(j * dilation, w_out), :]
            slab_ref[:, tap * c_in:(tap + 1) * c_in] = win.reshape(rows, c_in)
    # TODO(synk): for tiny Cin (4 here) the tap stores are lane-sparse; a
    # rows-on-lanes slab layout would fix that for small-Cin layers.

    # ---- single MXU matmul over the fused (padded) KH*KW*Cin contraction ----
    acc = jnp.dot(slab_ref[...], w_ref[...], preferred_element_type=jnp.float32)
    conv_ref[...] = acc.astype(conv_ref.dtype)        # lane-dense 128-wide store

    # ---- BN partial statistics for this tile (combined in the wrapper) ----
    s = jnp.sum(acc, axis=0, keepdims=True)            # (1, Cout_pad)
    ss = jnp.sum(acc * acc, axis=0, keepdims=True)     # (1, Cout_pad)
    stats_ref[...] = jnp.concatenate([s, ss], axis=0).reshape(1, 2, -1)


def _bn_relu_kernel(x_ref, scale_ref, shift_ref, o_ref):
    # y = (conv - mean) * inv_std * gamma + beta  ==  conv * scale + shift
    x = x_ref[...].astype(jnp.float32)
    o_ref[...] = jnp.maximum(x * scale_ref[...] + shift_ref[...], 0.0)


def conv_bn_relu(x_nchw, weight_oihw, gamma, beta, *, stride=1, padding=0,
                 dilation=1, compute_dtype=jnp.float32,
                 max_rows_per_tile=2048, row_tile=512):
    """x_nchw: (N, Cin, H, W); weight_oihw: (Cout, Cin, KH, KW). Returns NCHW f32."""
    if stride != 1:
        # TODO(synk): stride > 1 needs strided im2col slicing; not implemented.
        raise NotImplementedError("only stride == 1 is supported")

    n, c_in, h, w = x_nchw.shape
    c_out, _, kh, kw = weight_oihw.shape
    h_out = h + 2 * padding - dilation * (kh - 1)
    w_out = w + 2 * padding - dilation * (kw - 1)
    hp, wp = h + 2 * padding, w + 2 * padding
    k2c = kh * kw * c_in
    k2c_pad = _round_up(k2c, LANES)
    c_out_pad = _round_up(c_out, LANES)
    # TODO(synk): for Cout >= 256 on v6e/v7x, tile the matmul N dim at 256 so the
    # 256-wide MXU is filled; a single 128 pad is right for tiny Cout like here.

    conv_dtype = jnp.dtype(compute_dtype)  # bf16 halves the conv_flat HBM round trip
    rows_total = n * h_out * w_out

    # ---- VMEM-budget-aware sizing (v7x: 64 MiB physical vs 128 MiB v5e/v6e) ----
    cap = _vmem_capacity_bytes()
    vmem_limit = int(min(0.75 * cap, 96 * 1024 * 1024))
    budget = int(0.6 * vmem_limit)
    th = _choose_h_tile(h_out, w_out, hp, wp, c_in, k2c_pad, c_out_pad,
                        compute_dtype, conv_dtype, budget, max_rows_per_tile)
    h_tiles = h_out // th
    rows_tile = th * w_out

    # ---- layout glue (plain JAX) ----
    # TODO(synk): keep NHWC end-to-end in the surrounding model to drop these
    # transposes; also tile W with halo DMAs for extremely wide images.
    x_nhwc = jnp.transpose(x_nchw, (0, 2, 3, 1)).astype(compute_dtype)
    xp = jnp.pad(x_nhwc, ((0, 0), (padding, padding), (padding, padding), (0, 0)))
    w_mat = jnp.transpose(weight_oihw, (2, 3, 1, 0)).reshape(k2c, c_out)
    w_mat = jnp.pad(w_mat, ((0, k2c_pad - k2c), (0, c_out_pad - c_out)))
    w_mat = w_mat.astype(compute_dtype)

    cparams1 = pltpu.CompilerParams(
        dimension_semantics=("parallel", "parallel"),
        vmem_limit_bytes=vmem_limit)
    cparams2 = pltpu.CompilerParams(
        dimension_semantics=("parallel",),
        vmem_limit_bytes=vmem_limit)

    # ---- pass 1: conv (one MXU matmul per (batch, Hout-tile)) + BN partials ----
    conv_flat, stats = pl.pallas_call(
        functools.partial(_conv_stats_kernel, th=th, w_out=w_out, c_in=c_in,
                          kh=kh, kw=kw, dilation=dilation,
                          k2c=k2c, k2c_pad=k2c_pad),
        grid=(n, h_tiles),
        in_specs=[
            pl.BlockSpec((1, hp, wp, c_in), lambda b, t: (b, 0, 0, 0)),
            # TODO(synk): pipeline_mode=pl.Buffered(1) (or a one-shot DMA into
            # scratch) to drop the second resident weight copy for large Cout.
            pl.BlockSpec((k2c_pad, c_out_pad), lambda b, t: (0, 0)),
        ],
        out_specs=[
            pl.BlockSpec((rows_tile, c_out_pad),
                         lambda b, t, _ht=h_tiles: (b * _ht + t, 0)),
            pl.BlockSpec((1, 2, c_out_pad),
                         lambda b, t, _ht=h_tiles: (b * _ht + t, 0, 0)),
        ],
        out_shape=[
            jax.ShapeDtypeStruct((rows_total, c_out_pad), conv_dtype),
            jax.ShapeDtypeStruct((n * h_tiles, 2, c_out_pad), jnp.float32),
        ],
        scratch_shapes=[pltpu.VMEM((rows_tile, k2c_pad), compute_dtype)],
        compiler_params=cparams1,
    )(xp, w_mat)

    # ---- per-channel finalize (tiny, plain JAX): batch mean / biased variance ----
    # TODO(synk): E[x^2]-E[x]^2 can lose precision at very large N*H*W; use a
    # centered second pass / Welford combine for production-sized activations.
    count = jnp.float32(rows_total)
    mean = jnp.sum(stats[:, 0, :], axis=0) / count
    var = jnp.maximum(jnp.sum(stats[:, 1, :], axis=0) / count - mean * mean, 0.0)
    inv_std = jax.lax.rsqrt(var + BN_EPS)
    gamma_p = jnp.pad(gamma.astype(jnp.float32), (0, c_out_pad - c_out))
    beta_p = jnp.pad(beta.astype(jnp.float32), (0, c_out_pad - c_out))
    scale = (gamma_p * inv_std).reshape(1, c_out_pad)
    shift = (beta_p - mean * gamma_p * inv_std).reshape(1, c_out_pad)
    # TODO(synk): running_mean/running_var buffer updates are not produced.

    # ---- pass 2: fused normalize + ReLU over fixed lane-dense row tiles ----
    tr = _choose_row_tile(rows_total, c_out_pad, conv_dtype, budget, row_tile)
    y_flat = pl.pallas_call(
        _bn_relu_kernel,
        grid=(pl.cdiv(rows_total, tr),),
        in_specs=[
            pl.BlockSpec((tr, c_out_pad), lambda i: (i, 0)),
            pl.BlockSpec((1, c_out_pad), lambda i: (0, 0)),
            pl.BlockSpec((1, c_out_pad), lambda i: (0, 0)),
        ],
        out_specs=pl.BlockSpec((tr, c_out_pad), lambda i: (i, 0)),
        out_shape=jax.ShapeDtypeStruct((rows_total, c_out_pad), jnp.float32),
        compiler_params=cparams2,
    )(conv_flat, scale, shift)

    y = y_flat[:, :c_out].reshape(n, h_out, w_out, c_out)
    return jnp.transpose(y, (0, 3, 1, 2))  # back to NCHW


def _reference(x_nchw, weight_oihw, gamma, beta, *, padding=1, dilation=1):
    conv = jax.lax.conv_general_dilated(
        x_nchw, weight_oihw, window_strides=(1, 1),
        padding=((padding, padding), (padding, padding)),
        rhs_dilation=(dilation, dilation),
        dimension_numbers=("NCHW", "OIHW", "NCHW"),
        precision=jax.lax.Precision.HIGHEST)
    mean = jnp.mean(conv, axis=(0, 2, 3), keepdims=True)
    var = jnp.mean((conv - mean) ** 2, axis=(0, 2, 3), keepdims=True)
    y = (conv - mean) * jax.lax.rsqrt(var + BN_EPS)
    y = y * gamma.reshape(1, -1, 1, 1) + beta.reshape(1, -1, 1, 1)
    return jnp.maximum(y, 0.0)


if __name__ == "__main__":
    # Module config: in_channels=4, out_channels=8, kernel_size=3, padding=1.
    N, C_IN, H, W = 2, 4, 16, 16
    C_OUT, K = 8, 3

    key = jax.random.PRNGKey(0)
    kx, kw_, kg, kb = jax.random.split(key, 4)
    x = jax.random.normal(kx, (N, C_IN, H, W), dtype=jnp.float32)
    weight = jax.random.normal(kw_, (C_OUT, C_IN, K, K), dtype=jnp.float32) * 0.1
    gamma = 1.0 + 0.1 * jax.random.normal(kg, (C_OUT,), dtype=jnp.float32)
    beta = 0.1 * jax.random.normal(kb, (C_OUT,), dtype=jnp.float32)

    ref = _reference(x, weight, gamma, beta, padding=1, dilation=1)

    # f32 compute path (accuracy reference).
    out = conv_bn_relu(x, weight, gamma, beta, stride=1, padding=1, dilation=1)
    out = jax.block_until_ready(out)
    assert out.shape == (N, C_OUT, H, W), out.shape
    assert jnp.allclose(out, ref, atol=1e-3, rtol=1e-3), \
        float(jnp.max(jnp.abs(out - ref)))

    # bf16 MXU path with forced multi-tile pass-1 and 128-row pass-2 tiles
    # (exercises the Hout-tiling and fixed-row-tile logic on this small config).
    out_bf16 = conv_bn_relu(x, weight, gamma, beta, stride=1, padding=1,
                            dilation=1, compute_dtype=jnp.bfloat16,
                            max_rows_per_tile=128, row_tile=128)
    out_bf16 = jax.block_until_ready(out_bf16)
    assert jnp.allclose(out_bf16, ref, atol=1e-1, rtol=1e-1), \
        float(jnp.max(jnp.abs(out_bf16 - ref)))

    print("KERNEL_OK")
</pallas_src>

<mosaic_0001>
module attributes {stable_mosaic.version = 11 : i64} {
  func.func @_conv_stats_kernel(%arg0: i32, %arg1: i32, %arg2: memref<1x18x18x4xf32, #tpu.memory_space<vmem>>, %arg3: memref<128x128xf32, #tpu.memory_space<vmem>>, %arg4: memref<256x128xf32, #tpu.memory_space<vmem>>, %arg5: memref<1x2x128xf32, #tpu.memory_space<vmem>>, %arg6: memref<256x128xf32, #tpu.memory_space<vmem>>) attributes {dimension_semantics = [#tpu.dimension_semantics<parallel>, #tpu.dimension_semantics<parallel>], iteration_bounds = array<i64: 2, 1>, scalar_prefetch = 0 : i64, scratch_operands = 1 : i64, tpu.core_type = #tpu.core_type<tc>, window_params = [{transform_indices = @transform_0, window_bounds = array<i64: 1, 18, 18, 4>}, {pipeline_mode = #tpu.pipeline_mode<synchronous>, transform_indices = @transform_1, window_bounds = array<i64: 128, 128>}, {transform_indices = @transform_2, window_bounds = array<i64: 256, 128>}, {transform_indices = @transform_3, window_bounds = array<i64: 1, 2, 128>}]} {
    %c16_i32 = arith.constant 16 : i32
    %0 = arith.muli %arg1, %c16_i32 : i32
    %1 = tpu.assume_multiple %0, 16 : i32
    %cst = arith.constant 0.000000e+00 : f32
    %2 = vector.broadcast %cst : f32 to vector<256x92xf32>
    %c0 = arith.constant 0 : index
    %c36 = arith.constant 36 : index
    %3 = vector.load %arg6[%c0, %c36] : memref<256x128xf32, #tpu.memory_space<vmem>>, vector<256x92xf32>
    tpu.vector_store %arg6[%c0, %c36], %2 {strides = array<i32>} : memref<256x128xf32, #tpu.memory_space<vmem>>, vector<256x92xf32>,
    %c0_i32 = arith.constant 0 : i32
    %4 = arith.addi %1, %c0_i32 : i32
    %c0_0 = arith.constant 0 : index
    %5 = arith.index_cast %4 : i32 to index
    %c0_1 = arith.constant 0 : index
    %c0_2 = arith.constant 0 : index
    %6 = vector.load %arg2[%c0_0, %5, %c0_1, %c0_2] : memref<1x18x18x4xf32, #tpu.memory_space<vmem>>, vector<1x16x16x4xf32>
    %7 = vector.shape_cast %6 : vector<1x16x16x4xf32> to vector<16x16x4xf32>
    %8 = vector.shape_cast %7 : vector<16x16x4xf32> to vector<256x4xf32>
    %c0_3 = arith.constant 0 : index
    %c0_4 = arith.constant 0 : index
    %9 = vector.load %arg6[%c0_3, %c0_4] : memref<256x128xf32, #tpu.memory_space<vmem>>, vector<256x4xf32>
    tpu.vector_store %arg6[%c0_3, %c0_4], %8 {strides = array<i32>} : memref<256x128xf32, #tpu.memory_space<vmem>>, vector<256x4xf32>,
    %c0_i32_5 = arith.constant 0 : i32
    %10 = arith.addi %1, %c0_i32_5 : i32
    %c0_6 = arith.constant 0 : index
    %11 = arith.index_cast %10 : i32 to index
    %c1 = arith.constant 1 : index
    %c0_7 = arith.constant 0 : index
    %12 = vector.load %arg2[%c0_6, %11, %c1, %c0_7] : memref<1x18x18x4xf32, #tpu.memory_space<vmem>>, vector<1x16x16x4xf32>
    %13 = vector.shape_cast %12 : vector<1x16x16x4xf32> to vector<16x16x4xf32>
    %14 = vector.shape_cast %13 : vector<16x16x4xf32> to vector<256x4xf32>
    %c0_8 = arith.constant 0 : index
    %c4 = arith.constant 4 : index
    %15 = vector.load %arg6[%c0_8, %c4] : memref<256x128xf32, #tpu.memory_space<vmem>>, vector<256x4xf32>
    tpu.vector_store %arg6[%c0_8, %c4], %14 {strides = array<i32>} : memref<256x128xf32, #tpu.memory_space<vmem>>, vector<256x4xf32>,
    %c0_i32_9 = arith.constant 0 : i32
    %16 = arith.addi %1, %c0_i32_9 : i32
    %c0_10 = arith.constant 0 : index
    %17 = arith.index_cast %16 : i32 to index
    %c2 = arith.constant 2 : index
    %c0_11 = arith.constant 0 : index
    %18 = vector.load %arg2[%c0_10, %17, %c2, %c0_11] : memref<1x18x18x4xf32, #tpu.memory_space<vmem>>, vector<1x16x16x4xf32>
    %19 = vector.shape_cast %18 : vector<1x16x16x4xf32> to vector<16x16x4xf32>
    %20 = vector.shape_cast %19 : vector<16x16x4xf32> to vector<256x4xf32>
    %c0_12 = arith.constant 0 : index
    %c8 = arith.constant 8 : index
    %21 = vector.load %arg6[%c0_12, %c8] : memref<256x128xf32, #tpu.memory_space<vmem>>, vector<256x4xf32>
    tpu.vector_store %arg6[%c0_12, %c8], %20 {strides = array<i32>} : memref<256x128xf32, #tpu.memory_space<vmem>>, vector<256x4xf32>,
    %c1_i32 = arith.constant 1 : i32
    %22 = arith.addi %1, %c1_i32 : i32
    %c0_13 = arith.constant 0 : index
    %23 = arith.index_cast %22 : i32 to index
    %c0_14 = arith.constant 0 : index
    %c0_15 = arith.constant 0 : index
    %24 = vector.load %arg2[%c0_13, %23, %c0_14, %c0_15] : memref<1x18x18x4xf32, #tpu.memory_space<vmem>>, vector<1x16x16x4xf32>
    %25 = vector.shape_cast %24 : vector<1x16x16x4xf32> to vector<16x16x4xf32>
    %26 = vector.shape_cast %25 : vector<16x16x4xf32> to vector<256x4xf32>
    %c0_16 = arith.constant 0 : index
    %c12 = arith.constant 12 : index
    %27 = vector.load %arg6[%c0_16, %c12] : memref<256x128xf32, #tpu.memory_space<vmem>>, vector<256x4xf32>
    tpu.vector_store %arg6[%c0_16, %c12], %26 {strides = array<i32>} : memref<256x128xf32, #tpu.memory_space<vmem>>, vector<256x4xf32>,
    %c1_i32_17 = arith.constant 1 : i32
    %28 = arith.addi %1, %c1_i32_17 : i32
    %c0_18 = arith.constant 0 : index
    %29 = arith.index_cast %28 : i32 to index
    %c1_19 = arith.constant 1 : index
    %c0_20 = arith.constant 0 : index
    %30 = vector.load %arg2[%c0_18, %29, %c1_19, %c0_20] : memref<1x18x18x4xf32, #tpu.memory_space<vmem>>, vector<1x16x16x4xf32>
    %31 = vector.shape_cast %30 : vector<1x16x16x4xf32> to vector<16x16x4xf32>
    %32 = vector.shape_cast %31 : vector<16x16x4xf32> to vector<256x4xf32>
    %c0_21 = arith.constant 0 : index
    %c16 = arith.constant 16 : index
    %33 = vector.load %arg6[%c0_21, %c16] : memref<256x128xf32, #tpu.memory_space<vmem>>, vector<256x4xf32>
    tpu.vector_store %arg6[%c0_21, %c16], %32 {strides = array<i32>} : memref<256x128xf32, #tpu.memory_space<vmem>>, vector<256x4xf32>,
    %c1_i32_22 = arith.constant 1 : i32
    %34 = arith.addi %1, %c1_i32_22 : i32
    %c0_23 = arith.constant 0 : index
    %35 = arith.index_cast %34 : i32 to index
    %c2_24 = arith.constant 2 : index
    %c0_25 = arith.constant 0 : index
    %36 = vector.load %arg2[%c0_23, %35, %c2_24, %c0_25] : memref<1x18x18x4xf32, #tpu.memory_space<vmem>>, vector<1x16x16x4xf32>
    %37 = vector.shape_cast %36 : vector<1x16x16x4xf32> to vector<16x16x4xf32>
    %38 = vector.shape_cast %37 : vector<16x16x4xf32> to vector<256x4xf32>
    %c0_26 = arith.constant 0 : index
    %c20 = arith.constant 20 : index
    %39 = vector.load %arg6[%c0_26, %c20] : memref<256x128xf32, #tpu.memory_space<vmem>>, vector<256x4xf32>
    tpu.vector_store %arg6[%c0_26, %c20], %38 {strides = array<i32>} : memref<256x128xf32, #tpu.memory_space<vmem>>, vector<256x4xf32>,
    %c2_i32 = arith.constant 2 : i32
    %40 = arith.addi %1, %c2_i32 : i32
    %c0_27 = arith.constant 0 : index
    %41 = arith.index_cast %40 : i32 to index
    %c0_28 = arith.constant 0 : index
    %c0_29 = arith.constant 0 : index
    %42 = vector.load %arg2[%c0_27, %41, %c0_28, %c0_29] : memref<1x18x18x4xf32, #tpu.memory_space<vmem>>, vector<1x16x16x4xf32>
    %43 = vector.shape_cast %42 : vector<1x16x16x4xf32> to vector<16x16x4xf32>
    %44 = vector.shape_cast %43 : vector<16x16x4xf32> to vector<256x4xf32>
    %c0_30 = arith.constant 0 : index
    %c24 = arith.constant 24 : index
    %45 = vector.load %arg6[%c0_30, %c24] : memref<256x128xf32, #tpu.memory_space<vmem>>, vector<256x4xf32>
    tpu.vector_store %arg6[%c0_30, %c24], %44 {strides = array<i32>} : memref<256x128xf32, #tpu.memory_space<vmem>>, vector<256x4xf32>,
    %c2_i32_31 = arith.constant 2 : i32
    %46 = arith.addi %1, %c2_i32_31 : i32
    %c0_32 = arith.constant 0 : index
    %47 = arith.index_cast %46 : i32 to index
    %c1_33 = arith.constant 1 : index
    %c0_34 = arith.constant 0 : index
    %48 = vector.load %arg2[%c0_32, %47, %c1_33, %c0_34] : memref<1x18x18x4xf32, #tpu.memory_space<vmem>>, vector<1x16x16x4xf32>
    %49 = vector.shape_cast %48 : vector<1x16x16x4xf32> to vector<16x16x4xf32>
    %50 = vector.shape_cast %49 : vector<16x16x4xf32> to vector<256x4xf32>
    %c0_35 = arith.constant 0 : index
    %c28 = arith.constant 28 : index
    %51 = vector.load %arg6[%c0_35, %c28] : memref<256x128xf32, #tpu.memory_space<vmem>>, vector<256x4xf32>
    tpu.vector_store %arg6[%c0_35, %c28], %50 {strides = array<i32>} : memref<256x128xf32, #tpu.memory_space<vmem>>, vector<256x4xf32>,
    %c2_i32_36 = arith.constant 2 : i32
    %52 = arith.addi %1, %c2_i32_36 : i32
    %c0_37 = arith.constant 0 : index
    %53 = arith.index_cast %52 : i32 to index
    %c2_38 = arith.constant 2 : index
    %c0_39 = arith.constant 0 : index
    %54 = vector.load %arg2[%c0_37, %53, %c2_38, %c0_39] : memref<1x18x18x4xf32, #tpu.memory_space<vmem>>, vector<1x16x16x4xf32>
    %55 = vector.shape_cast %54 : vector<1x16x16x4xf32> to vector<16x16x4xf32>
    %56 = vector.shape_cast %55 : vector<16x16x4xf32> to vector<256x4xf32>
    %c0_40 = arith.constant 0 : index
    %c32 = arith.constant 32 : index
    %57 = vector.load %arg6[%c0_40, %c32] : memref<256x128xf32, #tpu.memory_space<vmem>>, vector<256x4xf32>
    tpu.vector_store %arg6[%c0_40, %c32], %56 {strides = array<i32>} : memref<256x128xf32, #tpu.memory_space<vmem>>, vector<256x4xf32>,
    %c0_41 = arith.constant 0 : index
    %c0_42 = arith.constant 0 : index
    %58 = vector.load %arg6[%c0_41, %c0_42] : memref<256x128xf32, #tpu.memory_space<vmem>>, vector<256x128xf32>
    %c0_43 = arith.constant 0 : index
    %c0_44 = arith.constant 0 : index
    %59 = vector.load %arg3[%c0_43, %c0_44] : memref<128x128xf32, #tpu.memory_space<vmem>>, vector<128x128xf32>
    %cst_45 = arith.constant dense<0.000000e+00> : vector<256x128xf32>
    %60 = tpu.matmul %58, %59, %cst_45 {dimension_numbers = #tpu.dot_dimension_numbers<[1], [0], [0], [1], [0, 0, 1, 1], [], []>} : vector<256x128xf32>, vector<128x128xf32>, vector<256x128xf32> -> vector<256x128xf32>
    %c0_46 = arith.constant 0 : index
    %c0_47 = arith.constant 0 : index
    %61 = vector.load %arg4[%c0_46, %c0_47] : memref<256x128xf32, #tpu.memory_space<vmem>>, vector<256x128xf32>
    tpu.vector_store %arg4[%c0_46, %c0_47], %60 {strides = array<i32>} : memref<256x128xf32, #tpu.memory_space<vmem>>, vector<256x128xf32>,
    %cst_48 = arith.constant dense<0.000000e+00> : vector<128xf32>
    %62 = vector.multi_reduction <add>, %60, %cst_48 [0] : vector<256x128xf32> to vector<128xf32>
    %63 = vector.shape_cast %62 : vector<128xf32> to vector<1x128xf32>
    %64 = arith.mulf %60, %60 : vector<256x128xf32>
    %cst_49 = arith.constant dense<0.000000e+00> : vector<128xf32>
    %65 = vector.multi_reduction <add>, %64, %cst_49 [0] : vector<256x128xf32> to vector<128xf32>
    %66 = vector.shape_cast %65 : vector<128xf32> to vector<1x128xf32>
    %67 = tpu.concatenate %63, %66 in 0 : vector<1x128xf32>, vector<1x128xf32> -> vector<2x128xf32>
    %68 = vector.shape_cast %67 : vector<2x128xf32> to vector<1x2x128xf32>
    %c0_50 = arith.constant 0 : index
    %c0_51 = arith.constant 0 : index
    %c0_52 = arith.constant 0 : index
    %69 = vector.load %arg5[%c0_50, %c0_51, %c0_52] : memref<1x2x128xf32, #tpu.memory_space<vmem>>, vector<1x2x128xf32>
    tpu.vector_store %arg5[%c0_50, %c0_51, %c0_52], %68 {strides = array<i32>} : memref<1x2x128xf32, #tpu.memory_space<vmem>>, vector<1x2x128xf32>,
    return
  }
  func.func @transform_0(%arg0: i32, %arg1: i32) -> (i32, i32, i32, i32) {
    %c0_i32 = arith.constant 0 : i32
    %c0_i32_0 = arith.constant 0 : i32
    %c0_i32_1 = arith.constant 0 : i32
    %c0_i32_2 = arith.constant 0 : i32
    return %arg0, %c0_i32, %c0_i32_0, %c0_i32_1 : i32, i32, i32, i32
  }
  func.func @transform_1(%arg0: i32, %arg1: i32) -> (i32, i32) {
    %c0_i32 = arith.constant 0 : i32
    %c0_i32_0 = arith.constant 0 : i32
    %c0_i32_1 = arith.constant 0 : i32
    return %c0_i32, %c0_i32_0 : i32, i32
  }
  func.func @transform_2(%arg0: i32, %arg1: i32) -> (i32, i32) {
    %c1_i32 = arith.constant 1 : i32
    %0 = arith.muli %arg0, %c1_i32 : i32
    %1 = arith.addi %0, %arg1 : i32
    %c0_i32 = arith.constant 0 : i32
    %c0_i32_0 = arith.constant 0 : i32
    return %1, %c0_i32 : i32, i32
  }
  func.func @transform_3(%arg0: i32, %arg1: i32) -> (i32, i32, i32) {
    %c1_i32 = arith.constant 1 : i32
    %0 = arith.muli %arg0, %c1_i32 : i32
    %1 = arith.addi %0, %arg1 : i32
    %c0_i32 = arith.constant 0 : i32
    %c0_i32_0 = arith.constant 0 : i32
    %c0_i32_1 = arith.constant 0 : i32
    return %1, %c0_i32, %c0_i32_0 : i32, i32, i32
  }
}

</mosaic_0001>

<bundles_post_ra>
// kernel: tpu_custom_call.1
= control target key start
LH: loop header
LB: loop body
LE: loop exit
PB: predicated region body
PF: predicated region fallthrough
CT: control target
= control target key end

     0   :  { %9 = vsyncpa [#allocation4], 0  ;;  %s4212_s0 = inlined_call_operand.vmem [shape: f32[2,18,18,4], index: 0, kind: input, shape index: {}]   ;;  %s4213_s1 = inlined_call_operand.vmem [shape: f32[128,128], index: 1, kind: input, shape index: {}]   ;;  %s4214_s2 = inlined_call_operand.hbm [shape: f32[512,128], index: 2, kind: output, shape index: {0}]   ;;  %s4215_s3 = inlined_call_operand.hbm [shape: f32[2,2,128], index: 3, kind: output, shape index: {1}]  }
   0x1   :  { %11 = vsyncpa [#allocation4 + $0x1], 0 }
   0x2   :  { %12 = vsyncpa [#allocation6], 0 }
   0x3   :  { %14 = vsyncpa [#allocation6 + $0x1], 0  ;;  %s3011_s12 = smov 0   ;;  %s3013_s13 = smov 0  }
   0x4   :  { %s3015_s14 = smov 0   ;;  %s3017_s15 = smov 0  }
   0x5   :  { %s3019_s16 = smov 0   ;;  %s3021_s17 = smov 0  }
   0x6 LB: > { %s2412_s18 = sadd.s32 4294967295, %s2977_s17   ;;  %s2413_s19 = sadd.s32 4294967294, %s2977_s17   ;;  %s2977_s17 = sphi %s3021_s17, %s20_s17   ;;  %s2973_s16 = sphi %s3019_s16, %s4222_s16   ;;  %s2969_s15 = sphi %s3017_s15, %s4221_s15   ;;  %s2965_s14 = sphi %s3015_s14, %s4220_s14   ;;  %s2961_s13 = sphi %s3013_s13, %s4219_s13   ;;  %s2957_s12 = sphi %s3011_s12, %s4218_s12  }
   0x7   : > { %s32_s20 = sadd.s32 1, %s2973_s16  ;;  %s88_s21 = sadd.s32 1, %s2965_s14 }
   0x8   : > { %p34_p0 = scmp.ge.s32.totalorder %s32_s20, 2  ;;  %p98_p1 = scmp.ne.s32.totalorder %s2965_s14, %s2961_s13 }
   0x9   : > { %p99_p2 = scmp.eq.s32.totalorder %s2412_s18, 1  ;;  %p104_p3 = scmp.ne.s32.totalorder %s2961_s13, %s2957_s12 }
   0xa   : > { %s4224_s20 = smov (%p34_p0, %s32_s20), 0  ;;  %p105_p5 = scmp.eq.s32.totalorder %s2413_s19, 1 }
   0xb   : > { %p3051_p4 = por %p99_p2, %p98_p1  ;;  %s85_s23 = ssub.s32 %s2973_s16, %s4224_s20 }
   0xc   : > { %p2416_p6 = scmp.ge.s32.totalorder %s2977_s17, 1  ;;  %p86_p7 = scmp.eq.s32.totalorder %s85_s23, 0 }
   0xd   : > { %p3058_p8 = por %p105_p5, %p104_p3  ;;  %p162_p9 = scmp.lt.s32.totalorder %s2977_s17, 3 }
   0xe   : > { %s3064_s25 = scalar_select %p86_p7, %s2965_s14, %s88_s21  }
   0xf   : > { %p163_p10 = pnand %p2416_p6, %p162_p9 }
  0x10   : > { %p191_p11 = scmp.lt.s32.totalorder (!%p163_p10), %s2969_s15, 1  ;;  %vm200_vm0 = vcmask (!%p163_p10), 1047840   ;;  %v2979_v0 = vmov (!%p163_p10), 0.0   ;;  %s2980_s4 = smov (!%p163_p10), 4   ;;  %vm267_vm1 = vcmask (!%p163_p10), 31744   ;;  %vm460_vm2 = vcmask (!%p163_p10), 64544  }
  0x11   : > { %166 = sbr.rel (%p163_p10) target bundleno = 919 (0x397), region = 28  ;;  %201 = vst.msk [vmem:[#allocation2] sm:$0xff] (!%p163_p10), %vm200_vm0, %v2979_v0  ;;  %202 = vst.msk [vmem:[#allocation2 + $0x8] sm:$0xff] (!%p163_p10), %vm200_vm0, %v2979_v0  ;;  %s2981_s5 = smov (!%p163_p10), 8   ;;  %vm653_vm3 = vcmask (!%p163_p10), 97344   ;;  %vm849_vm4 = vcmask (!%p163_p10), 130144  }
  0x12   : > { %203 = vst.msk [vmem:[#allocation2 + $0x10] sm:$0xff] (!%p163_p10), %vm200_vm0, %v2979_v0  ;;  %204 = vst.msk [vmem:[#allocation2 + $0x18] sm:$0xff] (!%p163_p10), %vm200_vm0, %v2979_v0  ;;  %s2982_s6 = smov (!%p163_p10), 12   ;;  %s2983_s9 = smov (!%p163_p10), 16   ;;  %vm1042_vm5 = vcmask (!%p163_p10), 162944   ;;  %vm1235_vm6 = vcmask (!%p163_p10), 195744  }
  0x13   : > { %205 = vst.msk [vmem:[#allocation2 + $0x20] sm:$0xff] (!%p163_p10), %vm200_vm0, %v2979_v0  ;;  %206 = vst.msk [vmem:[#allocation2 + $0x28] sm:$0xff] (!%p163_p10), %vm200_vm0, %v2979_v0  ;;  %s2984_s21 = smov (!%p163_p10), 20   ;;  %s2985_s29 = smov (!%p163_p10), 24   ;;  %vm1431_vm7 = vcmask (!%p163_p10), 228544   ;;  %vm1624_vm8 = vcmask (!%p163_p10), 261344  }
  0x14   : > { %207 = vst.msk [vmem:[#allocation2 + $0x30] sm:$0xff] (!%p163_p10), %vm200_vm0, %v2979_v0  ;;  %208 = vst.msk [vmem:[#allocation2 + $0x38] sm:$0xff] (!%p163_p10), %vm200_vm0, %v2979_v0  ;;  %s2986_s11 = smov (!%p163_p10), 28   ;;  %vm1817_vm9 = vcmask (!%p163_p10), 294144  }
  0x15   : > { %209 = vst.msk [vmem:[#allocation2 + $0x40] sm:$0xff] (!%p163_p10), %vm200_vm0, %v2979_v0  ;;  %210 = vst.msk [vmem:[#allocation2 + $0x48] sm:$0xff] (!%p163_p10), %vm200_vm0, %v2979_v0 }
  0x16   : > { %211 = vst.msk [vmem:[#allocation2 + $0x50] sm:$0xff] (!%p163_p10), %vm200_vm0, %v2979_v0  ;;  %212 = vst.msk [vmem:[#allocation2 + $0x58] sm:$0xff] (!%p163_p10), %vm200_vm0, %v2979_v0 }
  0x17   : > { %213 = vst.msk [vmem:[#allocation2 + $0x60] sm:$0xff] (!%p163_p10), %vm200_vm0, %v2979_v0  ;;  %214 = vst.msk [vmem:[#allocation2 + $0x68] sm:$0xff] (!%p163_p10), %vm200_vm0, %v2979_v0 }
  0x18   : > { %215 = vst.msk [vmem:[#allocation2 + $0x70] sm:$0xff] %vm200_vm0, %v2979_v0  ;;  %216 = vst.msk [vmem:[#allocation2 + $0x78] sm:$0xff] %vm200_vm0, %v2979_v0  ;;  %s192_s26 = scalar_select %p191_p11, %s2969_s15, 1 }
  0x19   : > { %217 = vst.msk [vmem:[#allocation2 + $0x80] sm:$0xff] %vm200_vm0, %v2979_v0  ;;  %218 = vst.msk [vmem:[#allocation2 + $0x88] sm:$0xff] %vm200_vm0, %v2979_v0 }
  0x1a   : > { %219 = vst.msk [vmem:[#allocation2 + $0x90] sm:$0xff] %vm200_vm0, %v2979_v0  ;;  %220 = vst.msk [vmem:[#allocation2 + $0x98] sm:$0xff] %vm200_vm0, %v2979_v0  ;;  %s2796_s27 = smul.u32 432, %s192_s26 }
  0x1b   : > { %221 = vst.msk [vmem:[#allocation2 + $0xa0] sm:$0xff] %vm200_vm0, %v2979_v0  ;;  %222 = vst.msk [vmem:[#allocation2 + $0xa8] sm:$0xff] %vm200_vm0, %v2979_v0 }
  0x1c   : > { %223 = vst.msk [vmem:[#allocation2 + $0xb0] sm:$0xff] %vm200_vm0, %v2979_v0  ;;  %224 = vst.msk [vmem:[#allocation2 + $0xb8] sm:$0xff] %vm200_vm0, %v2979_v0  ;;  %s3105_s30 = scalar_lea.vmem %s4212_s0, %s2796_s27  ;;  %s2987_s27 = smov 32  }
  0x1d   : > { %225 = vst.msk [vmem:[#allocation2 + $0xc0] sm:$0xff] %vm200_vm0, %v2979_v0  ;;  %226 = vst.msk [vmem:[#allocation2 + $0xc8] sm:$0xff] %vm200_vm0, %v2979_v0  ;;  %v300_v1 = vld [vmem:[%s3105_s30 + $0x1] sm:$0xff]  ;;  %v3109_v2 = vld [vmem:[%s3105_s30 + $0x19] sm:$0xff] }
  0x1e   : > { %227 = vst.msk [vmem:[#allocation2 + $0xd0] sm:$0xff] %vm200_vm0, %v2979_v0  ;;  %228 = vst.msk [vmem:[#allocation2 + $0xd8] sm:$0xff] %vm200_vm0, %v2979_v0  ;;  %364 = vrot.lane.b32.xlu0 %v300_v1, %s2980_s4  ;;  %368 = vrot.lane.b32.xlu1 %v3109_v2, %s2980_s4  ;;  %v301_v3 = vld [vmem:[%s3105_s30 + $0x9] sm:$0xff]  ;;  %v3116_v4 = vld [vmem:[%s3105_s30 + $0x21] sm:$0xff] }
  0x1f   : > { %229 = vst.msk [vmem:[#allocation2 + $0xe0] sm:$0xff] %vm200_vm0, %v2979_v0  ;;  %230 = vst.msk [vmem:[#allocation2 + $0xe8] sm:$0xff] %vm200_vm0, %v2979_v0  ;;  %v3122_v5 = vld [vmem:[%s3105_s30 + $0x31] sm:$0xff]  ;;  %v3125_v6 = vld [vmem:[%s3105_s30 + $0x39] sm:$0xff] }
  0x20   : > { %231 = vst.msk [vmem:[#allocation2 + $0xf0] sm:$0xff] %vm200_vm0, %v2979_v0  ;;  %232 = vst.msk [vmem:[#allocation2 + $0xf8] sm:$0xff] %vm200_vm0, %v2979_v0  ;;  %v3132_v7 = vld [vmem:[%s3105_s30 + $0x49] sm:$0xff]  ;;  %v3135_v8 = vld [vmem:[%s3105_s30 + $0x51] sm:$0xff] }
  0x21   : > { %v3142_v9 = vld [vmem:[%s3105_s30 + $0x61] sm:$0xff]  ;;  %v3145_v10 = vld [vmem:[%s3105_s30 + $0x69] sm:$0xff]  ;;  %v3152_v11 = vld [vmem:[%s3105_s30 + $0x79] sm:$0xff] }
  0x22   : > { %366 = vrot.lane.b32.xlu0 %v301_v3, %s2980_s4  ;;  %370 = vrot.lane.b32.xlu1 %v3116_v4, %s2980_s4  ;;  %v3155_v12 = vld [vmem:[%s3105_s30 + $0x81] sm:$0xff]  ;;  %v3163_v14 = vld [vmem:[%s3105_s30 + $0x18] sm:$0xff] }
  0x23   : > { %v235_v13 = vld [vmem:[%s3105_s30] sm:$0xff]  ;;  %v3166_v15 = vld [vmem:[%s3105_s30 + $0x91] sm:$0xff]  ;;  %270 = vst.msk [vmem:[#allocation2 + $0x10] sm:$0xff] %vm267_vm1, %v3163_v14  ;;  %v236_v17 = vld [vmem:[%s3105_s30 + $0x8] sm:$0xff] }
  0x24   : > { %v3169_v16 = vld [vmem:[%s3105_s30 + $0x99] sm:$0xff]  ;;  %268 = vst.msk [vmem:[#allocation2] sm:$0xff] %vm267_vm1, %v235_v13  ;;  %269 = vst.msk [vmem:[#allocation2 + $0x8] sm:$0xff] %vm267_vm1, %v236_v17  ;;  %v3180_v19 = vld [vmem:[%s3105_s30 + $0xa9] sm:$0xff] }
  0x25   : > { %v3177_v18 = vld [vmem:[%s3105_s30 + $0x20] sm:$0xff]  ;;  %v3185_v20 = vld [vmem:[%s3105_s30 + $0x30] sm:$0xff]  ;;  %v3188_v21 = vld [vmem:[%s3105_s30 + $0x38] sm:$0xff] }
  0x26   : > { %372 = vrot.lane.b32.xlu0 %v3122_v5, %s2980_s4  ;;  %374 = vrot.lane.b32.xlu1 %v3125_v6, %s2980_s4  ;;  %271 = vst.msk [vmem:[#allocation2 + $0x18] sm:$0xff] %vm267_vm1, %v3177_v18  ;;  %v315_v22 = vld [vmem:[%s3105_s30 + $0xb1] sm:$0xff]  ;;  %272 = vst.msk [vmem:[#allocation2 + $0x20] sm:$0xff] %vm267_vm1, %v3185_v20  ;;  %v3200_v23 = vld [vmem:[%s3105_s30 + $0x48] sm:$0xff] }
  0x27   : > { %273 = vst.msk [vmem:[#allocation2 + $0x28] sm:$0xff] %vm267_vm1, %v3188_v21  ;;  %274 = vst.msk [vmem:[#allocation2 + $0x30] sm:$0xff] %vm267_vm1, %v3200_v23  ;;  %v3205_v24 = vld [vmem:[%s3105_s30 + $0x50] sm:$0xff]  ;;  %v3208_v25 = vld [vmem:[%s3105_s30 + $0x60] sm:$0xff] }
  0x28   : > { %v3211_v26 = vld [vmem:[%s3105_s30 + $0x68] sm:$0xff]  ;;  %275 = vst.msk [vmem:[#allocation2 + $0x38] sm:$0xff] %vm267_vm1, %v3205_v24  ;;  %276 = vst.msk [vmem:[#allocation2 + $0x40] sm:$0xff] %vm267_vm1, %v3208_v25  ;;  %v3220_v27 = vld [vmem:[%s3105_s30 + $0x78] sm:$0xff] }
  0x29   : > { %277 = vst.msk [vmem:[#allocation2 + $0x48] sm:$0xff] %vm267_vm1, %v3211_v26  ;;  %v3223_v28 = vld [vmem:[%s3105_s30 + $0x80] sm:$0xff]  ;;  %v3226_v29 = vld [vmem:[%s3105_s30 + $0x90] sm:$0xff]  ;;  %278 = vst.msk [vmem:[#allocation2 + $0x50] sm:$0xff] %vm267_vm1, %v3220_v27 }
  0x2a   : > { %376 = vrot.lane.b32.xlu0 %v3132_v7, %s2980_s4  ;;  %378 = vrot.lane.b32.xlu1 %v3135_v8, %s2980_s4  ;;  %v316_v30 = vld [vmem:[%s3105_s30 + $0xc1] sm:$0xff]  ;;  %v317_v31 = vld [vmem:[%s3105_s30 + $0xc9] sm:$0xff]  ;;  %279 = vst.msk [vmem:[#allocation2 + $0x58] sm:$0xff] %vm267_vm1, %v3223_v28  ;;  %280 = vst.msk [vmem:[#allocation2 + $0x60] sm:$0xff] %vm267_vm1, %v3226_v29 }
  0x2b   : > { %v3237_v32 = vld [vmem:[%s3105_s30 + $0x98] sm:$0xff]  ;;  %v3240_v33 = vld [vmem:[%s3105_s30 + $0xa8] sm:$0xff]  ;;  %v3243_v34 = vld [vmem:[%s3105_s30 + $0xb0] sm:$0xff] }
  0x2c   : > { %281 = vst.msk [vmem:[#allocation2 + $0x68] sm:$0xff] %vm267_vm1, %v3237_v32  ;;  %282 = vst.msk [vmem:[#allocation2 + $0x70] sm:$0xff] %vm267_vm1, %v3240_v33  ;;  %v3255_v35 = vld [vmem:[%s3105_s30 + $0xc0] sm:$0xff]  ;;  %v3258_v36 = vld [vmem:[%s3105_s30 + $0xc8] sm:$0xff] }
  0x2d   : > { %283 = vst.msk [vmem:[#allocation2 + $0x78] sm:$0xff] %vm267_vm1, %v3243_v34  ;;  %284 = vst.msk [vmem:[#allocation2 + $0x80] sm:$0xff] %vm267_vm1, %v3255_v35  ;;  %v3265_v37 = vld [vmem:[%s3105_s30 + $0xd8] sm:$0xff]  ;;  %v3268_v38 = vld [vmem:[%s3105_s30 + $0xe0] sm:$0xff] }
  0x2e   : > { %380 = vrot.lane.b32.xlu0 %v3142_v9, %s2980_s4  ;;  %382 = vrot.lane.b32.xlu1 %v3145_v10, %s2980_s4  ;;  %285 = vst.msk [vmem:[#allocation2 + $0x88] sm:$0xff] %vm267_vm1, %v3258_v36  ;;  %v3271_v39 = vld [vmem:[%s3105_s30 + $0xf0] sm:$0xff]  ;;  %286 = vst.msk [vmem:[#allocation2 + $0x90] sm:$0xff] %vm267_vm1, %v3265_v37  ;;  %v3280_v40 = vld [vmem:[%s3105_s30 + $0xf8] sm:$0xff] }
  0x2f   : > { %287 = vst.msk [vmem:[#allocation2 + $0x98] sm:$0xff] %vm267_vm1, %v3268_v38  ;;  %288 = vst.msk [vmem:[#allocation2 + $0xa0] sm:$0xff] %vm267_vm1, %v3271_v39  ;;  %v3283_v41 = vld [vmem:[%s3105_s30 + $0x108] sm:$0xff]  ;;  %v3286_v42 = vld [vmem:[%s3105_s30 + $0x110] sm:$0xff] }
  0x30   : > { %289 = vst.msk [vmem:[#allocation2 + $0xa8] sm:$0xff] %vm267_vm1, %v3280_v40  ;;  %290 = vst.msk [vmem:[#allocation2 + $0xb0] sm:$0xff] %vm267_vm1, %v3283_v41  ;;  %v318_v43 = vld [vmem:[%s3105_s30 + $0xd9] sm:$0xff]  ;;  %v319_v44 = vld [vmem:[%s3105_s30 + $0xe1] sm:$0xff] }
  0x31   : > { %291 = vst.msk [vmem:[#allocation2 + $0xb8] sm:$0xff] %vm267_vm1, %v3286_v42  ;;  %v259_v45 = vld [vmem:[%s3105_s30 + $0x120] sm:$0xff]  ;;  %v260_v46 = vld [vmem:[%s3105_s30 + $0x128] sm:$0xff]  ;;  %v320_v47 = vld [vmem:[%s3105_s30 + $0xf1] sm:$0xff] }
  0x32   : > { %384 = vrot.lane.b32.xlu0 %v3152_v11, %s2980_s4  ;;  %386 = vrot.lane.b32.xlu1 %v3155_v12, %s2980_s4  ;;  %292 = vst.msk [vmem:[#allocation2 + $0xc0] sm:$0xff] %vm267_vm1, %v259_v45  ;;  %293 = vst.msk [vmem:[#allocation2 + $0xc8] sm:$0xff] %vm267_vm1, %v260_v46  ;;  %v321_v48 = vld [vmem:[%s3105_s30 + $0xf9] sm:$0xff]  ;;  %v322_v51 = vld [vmem:[%s3105_s30 + $0x109] sm:$0xff] }
  0x33   : > { %v261_v49 = vld [vmem:[%s3105_s30 + $0x138] sm:$0xff]  ;;  %v262_v50 = vld [vmem:[%s3105_s30 + $0x140] sm:$0xff]  ;;  %v263_v53 = vld [vmem:[%s3105_s30 + $0x150] sm:$0xff] }
  0x34   : > { %294 = vst.msk [vmem:[#allocation2 + $0xd0] sm:$0xff] %vm267_vm1, %v261_v49  ;;  %295 = vst.msk [vmem:[#allocation2 + $0xd8] sm:$0xff] %vm267_vm1, %v262_v50  ;;  %v323_v52 = vld [vmem:[%s3105_s30 + $0x111] sm:$0xff]  ;;  %v324_v55 = vld [vmem:[%s3105_s30 + $0x121] sm:$0xff] }
  0x35   : > { %296 = vst.msk [vmem:[#allocation2 + $0xe0] sm:$0xff] %vm267_vm1, %v263_v53  ;;  %v264_v54 = vld [vmem:[%s3105_s30 + $0x158] sm:$0xff]  ;;  %v325_v56 = vld [vmem:[%s3105_s30 + $0x129] sm:$0xff]  ;;  %v327_v60 = vld [vmem:[%s3105_s30 + $0x141] sm:$0xff] }
  0x36   : > { %388 = vrot.lane.b32.xlu0 %v3166_v15, %s2980_s4  ;;  %390 = vrot.lane.b32.xlu1 %v3169_v16, %s2980_s4  ;;  %297 = vst.msk [vmem:[#allocation2 + $0xe8] sm:$0xff] %vm267_vm1, %v264_v54  ;;  %v265_v57 = vld [vmem:[%s3105_s30 + $0x168] sm:$0xff]  ;;  %v266_v58 = vld [vmem:[%s3105_s30 + $0x170] sm:$0xff] }
  0x37   : > { %298 = vst.msk [vmem:[#allocation2 + $0xf0] sm:$0xff] %vm267_vm1, %v265_v57  ;;  %299 = vst.msk [vmem:[#allocation2 + $0xf8] sm:$0xff] %vm267_vm1, %v266_v58  ;;  %v326_v59 = vld [vmem:[%s3105_s30 + $0x139] sm:$0xff]  ;;  %v328_v61 = vld [vmem:[%s3105_s30 + $0x151] sm:$0xff] }
  0x38   : > { %v329_v62 = vld [vmem:[%s3105_s30 + $0x159] sm:$0xff]  ;;  %v330_v63 = vld [vmem:[%s3105_s30 + $0x169] sm:$0xff]  ;;  %v331_v0 = vld [vmem:[%s3105_s30 + $0x171] sm:$0xff] }
  0x39   : > { %v493_v1 = vld [vmem:[%s3105_s30 + $0x2] sm:$0xff]  ;;  %v494_v3 = vld [vmem:[%s3105_s30 + $0xa] sm:$0xff]  ;;  %v3345_v13 = vld [vmem:[%s3105_s30 + $0x1a] sm:$0xff] }
  0x3a   : > { %392 = vrot.lane.b32.xlu0 %v3180_v19, %s2980_s4  ;;  %394 = vrot.lane.b32.xlu1 %v315_v22, %s2980_s4  ;;  %v3348_v17 = vld [vmem:[%s3105_s30 + $0x22] sm:$0xff]  ;;  %v3355_v22 = vld [vmem:[%s3105_s30 + $0x32] sm:$0xff] }
  0x3b   : > { %v3378_v45 = vld [vmem:[%s3105_s30 + $0x6a] sm:$0xff]  ;;  %v3385_v46 = vld [vmem:[%s3105_s30 + $0x7a] sm:$0xff] }
  0x3c   : > { %v3398_v49 = vld [vmem:[%s3105_s30 + $0x9a] sm:$0xff]  ;;  %v3405_v50 = vld [vmem:[%s3105_s30 + $0xaa] sm:$0xff] }
  0x3d   : > { %v510_v53 = vld [vmem:[%s3105_s30 + $0xca] sm:$0xff]  ;;  %v511_v54 = vld [vmem:[%s3105_s30 + $0xda] sm:$0xff] }
  0x3e   : > { %396 = vrot.lane.b32.xlu0 %v316_v30, %s2980_s4  ;;  %398 = vrot.lane.b32.xlu1 %v317_v31, %s2980_s4  ;;  %v3358_v30 = vld [vmem:[%s3105_s30 + $0x3a] sm:$0xff]  ;;  %v3365_v31 = vld [vmem:[%s3105_s30 + $0x4a] sm:$0xff] }
  0x3f   : > { %v514_v57 = vld [vmem:[%s3105_s30 + $0xfa] sm:$0xff]  ;;  %v515_v58 = vld [vmem:[%s3105_s30 + $0x10a] sm:$0xff] }
  0x42   : > { %400 = vrot.lane.b32.xlu0 %v318_v43, %s2980_s4  ;;  %402 = vrot.lane.b32.xlu1 %v319_v44, %s2980_s4  ;;  %v3368_v43 = vld [vmem:[%s3105_s30 + $0x52] sm:$0xff]  ;;  %v3375_v44 = vld [vmem:[%s3105_s30 + $0x62] sm:$0xff] }
  0x46   : > { %404 = vrot.lane.b32.xlu0 %v320_v47, %s2980_s4  ;;  %406 = vrot.lane.b32.xlu1 %v321_v48, %s2980_s4  ;;  %v3388_v47 = vld [vmem:[%s3105_s30 + $0x82] sm:$0xff]  ;;  %v3395_v48 = vld [vmem:[%s3105_s30 + $0x92] sm:$0xff] }
  0x4a   : > { %408 = vrot.lane.b32.xlu0 %v322_v51, %s2980_s4  ;;  %410 = vrot.lane.b32.xlu1 %v323_v52, %s2980_s4  ;;  %v3408_v51 = vld [vmem:[%s3105_s30 + $0xb2] sm:$0xff]  ;;  %v509_v52 = vld [vmem:[%s3105_s30 + $0xc2] sm:$0xff] }
  0x4e   : > { %412 = vrot.lane.b32.xlu0 %v324_v55, %s2980_s4  ;;  %414 = vrot.lane.b32.xlu1 %v325_v56, %s2980_s4  ;;  %v512_v55 = vld [vmem:[%s3105_s30 + $0xe2] sm:$0xff]  ;;  %v513_v56 = vld [vmem:[%s3105_s30 + $0xf2] sm:$0xff] }
  0x52   : > { %416 = vrot.lane.b32.xlu0 %v326_v59, %s2980_s4  ;;  %418 = vrot.lane.b32.xlu1 %v327_v60, %s2980_s4  ;;  %v516_v59 = vld [vmem:[%s3105_s30 + $0x112] sm:$0xff]  ;;  %v517_v60 = vld [vmem:[%s3105_s30 + $0x122] sm:$0xff] }
  0x56   : > { %420 = vrot.lane.b32.xlu0 %v328_v61, %s2980_s4  ;;  %422 = vrot.lane.b32.xlu1 %v329_v62, %s2980_s4  ;;  %v518_v61 = vld [vmem:[%s3105_s30 + $0x12a] sm:$0xff]  ;;  %v519_v62 = vld [vmem:[%s3105_s30 + $0x13a] sm:$0xff] }
  0x5a   : > { %424 = vrot.lane.b32.xlu0 %v330_v63, %s2980_s4  ;;  %426 = vrot.lane.b32.xlu1 %v331_v0, %s2980_s4  ;;  %v520_v63 = vld [vmem:[%s3105_s30 + $0x142] sm:$0xff] }
  0x5e   : > { %557 = vrot.lane.b32.xlu0 %v493_v1, %s2981_s5  ;;  %559 = vrot.lane.b32.xlu1 %v494_v3, %s2981_s5  ;;  %v521_v3 = vld [vmem:[%s3105_s30 + $0x152] sm:$0xff] }
  0x62   : > { %561 = vrot.lane.b32.xlu0 %v3345_v13, %s2981_s5  ;;  %563 = vrot.lane.b32.xlu1 %v3348_v17, %s2981_s5 }
  0x66   : > { %565 = vrot.lane.b32.xlu0 %v3355_v22, %s2981_s5  ;;  %567 = vrot.lane.b32.xlu1 %v3358_v30, %s2981_s5 }
  0x6a   : > { %569 = vrot.lane.b32.xlu0 %v3365_v31, %s2981_s5  ;;  %571 = vrot.lane.b32.xlu1 %v3368_v43, %s2981_s5 }
  0x6e   : > { %573 = vrot.lane.b32.xlu0 %v3375_v44, %s2981_s5  ;;  %575 = vrot.lane.b32.xlu1 %v3378_v45, %s2981_s5 }
  0x72   : > { %577 = vrot.lane.b32.xlu0 %v3385_v46, %s2981_s5  ;;  %579 = vrot.lane.b32.xlu1 %v3388_v47, %s2981_s5 }
  0x76   : > { %581 = vrot.lane.b32.xlu0 %v3395_v48, %s2981_s5  ;;  %583 = vrot.lane.b32.xlu1 %v3398_v49, %s2981_s5 }
  0x7a   : > { %585 = vrot.lane.b32.xlu0 %v3405_v50, %s2981_s5  ;;  %587 = vrot.lane.b32.xlu1 %v3408_v51, %s2981_s5 }
  0x7e   : > { %589 = vrot.lane.b32.xlu0 %v509_v52, %s2981_s5  ;;  %591 = vrot.lane.b32.xlu1 %v510_v53, %s2981_s5  ;;  %v522_v52 = vld [vmem:[%s3105_s30 + $0x15a] sm:$0xff] }
  0x82   : > { %593 = vrot.lane.b32.xlu0 %v511_v54, %s2981_s5  ;;  %595 = vrot.lane.b32.xlu1 %v512_v55, %s2981_s5  ;;  %v523_v55 = vld [vmem:[%s3105_s30 + $0x16a] sm:$0xff] }
  0x86   : > { %597 = vrot.lane.b32.xlu0 %v513_v56, %s2981_s5  ;;  %599 = vrot.lane.b32.xlu1 %v514_v57, %s2981_s5  ;;  %v524_v56 = vld [vmem:[%s3105_s30 + $0x172] sm:$0xff] }
  0x8a   : > { %601 = vrot.lane.b32.xlu0 %v515_v58, %s2981_s5  ;;  %603 = vrot.lane.b32.xlu1 %v516_v59, %s2981_s5 }
  0x8e   : > { %605 = vrot.lane.b32.xlu0 %v517_v60, %s2981_s5  ;;  %607 = vrot.lane.b32.xlu1 %v518_v61, %s2981_s5 }
  0x90   : > { %v365_v0 = vpop.permute.xlu0 %364  ;;  %v369_v1 = vpop.permute.xlu1 %368 }
  0x91   : > { %461 = vst.msk [vmem:[#allocation2] sm:$0xff] %vm460_vm2, %v365_v0  ;;  %463 = vst.msk [vmem:[#allocation2 + $0x10] sm:$0xff] %vm460_vm2, %v369_v1 }
  0x92   : > { %609 = vrot.lane.b32.xlu0 %v519_v62, %s2981_s5  ;;  %611 = vrot.lane.b32.xlu1 %v520_v63, %s2981_s5  ;;  %v1882_v63 = vld [vmem:[%s4213_s1] sm:$0xff] }
  0x94   : > { %v367_v53 = vpop.permute.xlu0 %366  ;;  %v371_v54 = vpop.permute.xlu1 %370 }
  0x95   : > { %462 = vst.msk [vmem:[#allocation2 + $0x8] sm:$0xff] %vm460_vm2, %v367_v53  ;;  %464 = vst.msk [vmem:[#allocation2 + $0x18] sm:$0xff] %vm460_vm2, %v371_v54 }
  0x96   : > { %613 = vrot.lane.b32.xlu0 %v521_v3, %s2981_s5  ;;  %615 = vrot.lane.b32.xlu1 %v522_v52, %s2981_s5  ;;  %v1884_v3 = vld [vmem:[%s4213_s1 + $0x10] sm:$0xff]  ;;  %v1885_v52 = vld [vmem:[%s4213_s1 + $0x18] sm:$0xff] }
  0x97   : > { %v2752_v53 = vpack.c.bf16 %v1885_v52, %v1884_v3 }
  0x98   : > { %v373_v57 = vpop.permute.xlu0 %372  ;;  %v375_v58 = vpop.permute.xlu1 %374 }
  0x99   : > { %465 = vst.msk [vmem:[#allocation2 + $0x20] sm:$0xff] %vm460_vm2, %v373_v57  ;;  %466 = vst.msk [vmem:[#allocation2 + $0x28] sm:$0xff] %vm460_vm2, %v375_v58  ;;  %v1887_v57 = vld [vmem:[%s4213_s1 + $0x28] sm:$0xff] }
  0x9a   : > { %617 = vrot.lane.b32.xlu0 %v523_v55, %s2981_s5  ;;  %619 = vrot.lane.b32.xlu1 %v524_v56, %s2981_s5  ;;  %v1886_v56 = vld [vmem:[%s4213_s1 + $0x20] sm:$0xff] }
  0x9c   : > { %v377_v59 = vpop.permute.xlu0 %376  ;;  %v379_v60 = vpop.permute.xlu1 %378 }
  0x9d   : > { %467 = vst.msk [vmem:[#allocation2 + $0x30] sm:$0xff] %vm460_vm2, %v377_v59  ;;  %468 = vst.msk [vmem:[#allocation2 + $0x38] sm:$0xff] %vm460_vm2, %v379_v60  ;;  %v2756_v60 = vpack.c.bf16 %v1887_v57, %v1886_v56 }
  0x9e   : > { %753 = vrot.lane.b32.xlu0 %v3163_v14, %s2982_s6  ;;  %755 = vrot.lane.b32.xlu1 %v3177_v18, %s2982_s6  ;;  %v1883_v14 = vld [vmem:[%s4213_s1 + $0x8] sm:$0xff] }
  0x9f   : > { %v2748_v18 = vpack.c.bf16 %v1883_v14, %v1882_v63 }
  0xa0   : > { %v381_v61 = vpop.permute.xlu0 %380  ;;  %v383_v62 = vpop.permute.xlu1 %382 }
  0xa1   : > { %469 = vst.msk [vmem:[#allocation2 + $0x40] sm:$0xff] %vm460_vm2, %v381_v61  ;;  %470 = vst.msk [vmem:[#allocation2 + $0x48] sm:$0xff] %vm460_vm2, %v383_v62  ;;  %2749 = vmatprep.subr.bf16.mxu0 %v2748_v18  ;;  %2780 = vmatprep.subr.bf16.mxu1 %v2748_v18  ;;  %v1888_v61 = vld [vmem:[%s4213_s1 + $0x30] sm:$0xff]  ;;  %v1889_v62 = vld [vmem:[%s4213_s1 + $0x38] sm:$0xff] }
  0xa2   : > { %757 = vrot.lane.b32.xlu0 %v3185_v20, %s2982_s6  ;;  %759 = vrot.lane.b32.xlu1 %v3188_v21, %s2982_s6  ;;  %v2760_v63 = vpack.c.bf16 %v1889_v62, %v1888_v61 }
  0xa3   : > { %2751 = vmatpush3.bf16.msra.mxu0 %v2748_v18  ;;  %2788 = vmatpush3.bf16.msra.mxu1 %v2748_v18 }
  0xa4   : > { %v385_v0 = vpop.permute.xlu0 %384  ;;  %v387_v1 = vpop.permute.xlu1 %386  ;;  %2753 = vmatprep.subr.bf16.mxu0 %v2752_v53  ;;  %2781 = vmatprep.subr.bf16.mxu1 %v2752_v53 }
  0xa5   : > { %471 = vst.msk [vmem:[#allocation2 + $0x50] sm:$0xff] %vm460_vm2, %v385_v0  ;;  %472 = vst.msk [vmem:[#allocation2 + $0x58] sm:$0xff] %vm460_vm2, %v387_v1  ;;  %v1890_v0 = vld [vmem:[%s4213_s1 + $0x40] sm:$0xff]  ;;  %v1891_v1 = vld [vmem:[%s4213_s1 + $0x48] sm:$0xff] }
  0xa6   : > { %761 = vrot.lane.b32.xlu0 %v3200_v23, %s2982_s6  ;;  %763 = vrot.lane.b32.xlu1 %v3205_v24, %s2982_s6  ;;  %v2764_v3 = vpack.c.bf16 %v1891_v1, %v1890_v0 }
  0xa7   : > { %2755 = vmatpush3.bf16.msra.mxu0 %v2752_v53  ;;  %2789 = vmatpush3.bf16.msra.mxu1 %v2752_v53 }
  0xa8   : > { %v389_v54 = vpop.permute.xlu0 %388  ;;  %v391_v55 = vpop.permute.xlu1 %390  ;;  %2757 = vmatprep.subr.bf16.mxu0 %v2756_v60  ;;  %2782 = vmatprep.subr.bf16.mxu1 %v2756_v60 }
  0xa9   : > { %473 = vst.msk [vmem:[#allocation2 + $0x60] sm:$0xff] %vm460_vm2, %v389_v54  ;;  %474 = vst.msk [vmem:[#allocation2 + $0x68] sm:$0xff] %vm460_vm2, %v391_v55 }
  0xaa   : > { %765 = vrot.lane.b32.xlu0 %v3208_v25, %s2982_s6  ;;  %767 = vrot.lane.b32.xlu1 %v3211_v26, %s2982_s6 }
  0xab   : > { %2759 = vmatpush3.bf16.msra.mxu0 %v2756_v60  ;;  %2790 = vmatpush3.bf16.msra.mxu1 %v2756_v60 }
  0xac   : > { %v393_v58 = vpop.permute.xlu0 %392  ;;  %v395_v59 = vpop.permute.xlu1 %394  ;;  %2761 = vmatprep.subr.bf16.mxu0 %v2760_v63  ;;  %2783 = vmatprep.subr.bf16.mxu1 %v2760_v63 }
  0xad   : > { %475 = vst.msk [vmem:[#allocation2 + $0x70] sm:$0xff] %vm460_vm2, %v393_v58  ;;  %476 = vst.msk [vmem:[#allocation2 + $0x78] sm:$0xff] %vm460_vm2, %v395_v59 }
  0xae   : > { %769 = vrot.lane.b32.xlu0 %v3220_v27, %s2982_s6  ;;  %771 = vrot.lane.b32.xlu1 %v3223_v28, %s2982_s6 }
  0xaf   : > { %2763 = vmatpush3.bf16.msra.mxu0 %v2760_v63  ;;  %2791 = vmatpush3.bf16.msra.mxu1 %v2760_v63 }
  0xb0   : > { %v397_v14 = vpop.permute.xlu0 %396  ;;  %v399_v18 = vpop.permute.xlu1 %398  ;;  %2765 = vmatprep.subr.bf16.mxu0 %v2764_v3  ;;  %2784 = vmatprep.subr.bf16.mxu1 %v2764_v3 }
  0xb1   : > { %477 = vst.msk [vmem:[#allocation2 + $0x80] sm:$0xff] %vm460_vm2, %v397_v14  ;;  %478 = vst.msk [vmem:[#allocation2 + $0x88] sm:$0xff] %vm460_vm2, %v399_v18 }
  0xb2   : > { %946 = vrot.lane.b32.xlu0 %v3109_v2, %s2983_s9  ;;  %948 = vrot.lane.b32.xlu1 %v3116_v4, %s2983_s9  ;;  %v1892_v2 = vld [vmem:[%s4213_s1 + $0x50] sm:$0xff]  ;;  %v1893_v4 = vld [vmem:[%s4213_s1 + $0x58] sm:$0xff] }
  0xb3   : > { %v2768_v54 = vpack.c.bf16 %v1893_v4, %v1892_v2  ;;  %2767 = vmatpush3.bf16.msra.mxu0 %v2764_v3  ;;  %2792 = vmatpush3.bf16.msra.mxu1 %v2764_v3 }
  0xb4   : > { %v401_v52 = vpop.permute.xlu0 %400  ;;  %v403_v53 = vpop.permute.xlu1 %402 }
  0xb5   : > { %479 = vst.msk [vmem:[#allocation2 + $0x90] sm:$0xff] %vm460_vm2, %v401_v52  ;;  %480 = vst.msk [vmem:[#allocation2 + $0x98] sm:$0xff] %vm460_vm2, %v403_v53  ;;  %2769 = vmatprep.subr.bf16.mxu0 %v2768_v54  ;;  %2785 = vmatprep.subr.bf16.mxu1 %v2768_v54 }
  0xb6   : > { %1139 = vrot.lane.b32.xlu0 %v3345_v13, %s2984_s21  ;;  %1141 = vrot.lane.b32.xlu1 %v3348_v17, %s2984_s21  ;;  %v1894_v13 = vld [vmem:[%s4213_s1 + $0x60] sm:$0xff]  ;;  %v1895_v17 = vld [vmem:[%s4213_s1 + $0x68] sm:$0xff] }
  0xb7   : > { %v2772_v57 = vpack.c.bf16 %v1895_v17, %v1894_v13  ;;  %2771 = vmatpush3.bf16.msra.mxu0 %v2768_v54  ;;  %2793 = vmatpush3.bf16.msra.mxu1 %v2768_v54 }
  0xb8   : > { %v405_v55 = vpop.permute.xlu0 %404  ;;  %v407_v56 = vpop.permute.xlu1 %406 }
  0xb9   : > { %481 = vst.msk [vmem:[#allocation2 + $0xa0] sm:$0xff] %vm460_vm2, %v405_v55  ;;  %482 = vst.msk [vmem:[#allocation2 + $0xa8] sm:$0xff] %vm460_vm2, %v407_v56  ;;  %2773 = vmatprep.subr.bf16.mxu0 %v2772_v57  ;;  %2786 = vmatprep.subr.bf16.mxu1 %v2772_v57 }
  0xba   : > { %1335 = vrot.lane.b32.xlu0 %v3185_v20, %s2985_s29  ;;  %1337 = vrot.lane.b32.xlu1 %v3188_v21, %s2985_s29  ;;  %v1896_v20 = vld [vmem:[%s4213_s1 + $0x70] sm:$0xff]  ;;  %v1897_v21 = vld [vmem:[%s4213_s1 + $0x78] sm:$0xff] }
  0xbb   : > { %2775 = vmatpush3.bf16.msra.mxu0 %v2772_v57  ;;  %v2776_v62 = vpack.c.bf16 %v1897_v21, %v1896_v20  ;;  %2794 = vmatpush3.bf16.msra.mxu1 %v2772_v57 }
  0xbc   : > { %v409_v58 = vpop.permute.xlu0 %408  ;;  %v411_v59 = vpop.permute.xlu1 %410 }
  0xbd   : > { %483 = vst.msk [vmem:[#allocation2 + $0xb0] sm:$0xff] %vm460_vm2, %v409_v58  ;;  %484 = vst.msk [vmem:[#allocation2 + $0xb8] sm:$0xff] %vm460_vm2, %v411_v59  ;;  %2777 = vmatprep.subr.bf16.mxu0 %v2776_v62  ;;  %2787 = vmatprep.subr.bf16.mxu1 %v2776_v62 }
  0xbe   : > { %1528 = vrot.lane.b32.xlu0 %v3122_v5, %s2986_s11  ;;  %950 = vrot.lane.b32.xlu1 %v3122_v5, %s2983_s9 }
  0xbf   : > { %2779 = vmatpush3.bf16.msra.mxu0 %v2776_v62  ;;  %2795 = vmatpush3.bf16.msra.mxu1 %v2776_v62 }
  0xc0   : > { %v413_v60 = vpop.permute.xlu0 %412  ;;  %v415_v61 = vpop.permute.xlu1 %414 }
  0xc1   : > { %485 = vst.msk [vmem:[#allocation2 + $0xc0] sm:$0xff] %vm460_vm2, %v413_v60  ;;  %486 = vst.msk [vmem:[#allocation2 + $0xc8] sm:$0xff] %vm460_vm2, %v415_v61 }
  0xc2   : > { %1530 = vrot.lane.b32.xlu0 %v3125_v6, %s2986_s11  ;;  %1721 = vrot.lane.b32.xlu1 %v3355_v22, %s2987_s27 }
  0xc4   : > { %v417_v5 = vpop.permute.xlu0 %416  ;;  %v419_v63 = vpop.permute.xlu1 %418 }
  0xc5   : > { %487 = vst.msk [vmem:[#allocation2 + $0xd0] sm:$0xff] %vm460_vm2, %v417_v5  ;;  %488 = vst.msk [vmem:[#allocation2 + $0xd8] sm:$0xff] %vm460_vm2, %v419_v63 }
  0xc6   : > { %952 = vrot.lane.b32.xlu0 %v3125_v6, %s2983_s9  ;;  %1143 = vrot.lane.b32.xlu1 %v3355_v22, %s2984_s21 }
  0xc8   : > { %v421_v14 = vpop.permute.xlu0 %420  ;;  %v423_v18 = vpop.permute.xlu1 %422 }
  0xc9   : > { %489 = vst.msk [vmem:[#allocation2 + $0xe0] sm:$0xff] %vm460_vm2, %v421_v14  ;;  %490 = vst.msk [vmem:[#allocation2 + $0xe8] sm:$0xff] %vm460_vm2, %v423_v18 }
  0xca   : > { %1723 = vrot.lane.b32.xlu0 %v3358_v30, %s2987_s27  ;;  %1145 = vrot.lane.b32.xlu1 %v3358_v30, %s2984_s21 }
  0xcc   : > { %v425_v0 = vpop.permute.xlu0 %424  ;;  %v427_v1 = vpop.permute.xlu1 %426 }
  0xcd   : > { %491 = vst.msk [vmem:[#allocation2 + $0xf0] sm:$0xff] %vm460_vm2, %v425_v0  ;;  %492 = vst.msk [vmem:[#allocation2 + $0xf8] sm:$0xff] %vm460_vm2, %v427_v1 }
  0xce   : > { %1339 = vrot.lane.b32.xlu0 %v3200_v23, %s2985_s29  ;;  %1341 = vrot.lane.b32.xlu1 %v3205_v24, %s2985_s29 }
  0xd0   : > { %v558_v6 = vpop.permute.xlu0 %557  ;;  %v560_v22 = vpop.permute.xlu1 %559 }
  0xd1   : > { %654 = vst.msk [vmem:[#allocation2] sm:$0xff] %vm653_vm3, %v558_v6  ;;  %655 = vst.msk [vmem:[#allocation2 + $0x8] sm:$0xff] %vm653_vm3, %v560_v22 }
  0xd2   : > { %1532 = vrot.lane.b32.xlu0 %v3132_v7, %s2986_s11  ;;  %954 = vrot.lane.b32.xlu1 %v3132_v7, %s2983_s9 }
  0xd4   : > { %v562_v30 = vpop.permute.xlu0 %561  ;;  %v564_v3 = vpop.permute.xlu1 %563 }
  0xd5   : > { %656 = vst.msk [vmem:[#allocation2 + $0x10] sm:$0xff] %vm653_vm3, %v562_v30  ;;  %657 = vst.msk [vmem:[#allocation2 + $0x18] sm:$0xff] %vm653_vm3, %v564_v3 }
  0xd6   : > { %1534 = vrot.lane.b32.xlu0 %v3135_v8, %s2986_s11  ;;  %1725 = vrot.lane.b32.xlu1 %v3365_v31, %s2987_s27 }
  0xd8   : > { %v566_v23 = vpop.permute.xlu0 %565  ;;  %v568_v24 = vpop.permute.xlu1 %567 }
  0xd9   : > { %658 = vst.msk [vmem:[#allocation2 + $0x20] sm:$0xff] %vm653_vm3, %v566_v23  ;;  %659 = vst.msk [vmem:[#allocation2 + $0x28] sm:$0xff] %vm653_vm3, %v568_v24 }
  0xda   : > { %956 = vrot.lane.b32.xlu0 %v3135_v8, %s2983_s9  ;;  %1147 = vrot.lane.b32.xlu1 %v3365_v31, %s2984_s21 }
  0xdc   : > { %v570_v7 = vpop.permute.xlu0 %569  ;;  %v572_v52 = vpop.permute.xlu1 %571 }
  0xdd   : > { %660 = vst.msk [vmem:[#allocation2 + $0x30] sm:$0xff] %vm653_vm3, %v570_v7  ;;  %661 = vst.msk [vmem:[#allocation2 + $0x38] sm:$0xff] %vm653_vm3, %v572_v52  ;;  %v2592_v7 = vld [vmem:[%s3105_s30 + $0xc2] sm:$0xff] }
  0xde   : > { %1727 = vrot.lane.b32.xlu0 %v3368_v43, %s2987_s27  ;;  %1149 = vrot.lane.b32.xlu1 %v3368_v43, %s2984_s21 }
  0xe0   : > { %v574_v53 = vpop.permute.xlu0 %573  ;;  %v576_v2 = vpop.permute.xlu1 %575 }
  0xe1   : > { %662 = vst.msk [vmem:[#allocation2 + $0x40] sm:$0xff] %vm653_vm3, %v574_v53  ;;  %663 = vst.msk [vmem:[#allocation2 + $0x48] sm:$0xff] %vm653_vm3, %v576_v2 }
  0xe2   : > { %1343 = vrot.lane.b32.xlu0 %v3208_v25, %s2985_s29  ;;  %1345 = vrot.lane.b32.xlu1 %v3211_v26, %s2985_s29 }
  0xe4   : > { %v578_v8 = vpop.permute.xlu0 %577  ;;  %v580_v31 = vpop.permute.xlu1 %579 }
  0xe5   : > { %664 = vst.msk [vmem:[#allocation2 + $0x50] sm:$0xff] %vm653_vm3, %v578_v8  ;;  %665 = vst.msk [vmem:[#allocation2 + $0x58] sm:$0xff] %vm653_vm3, %v580_v31 }
  0xe6   : > { %1536 = vrot.lane.b32.xlu0 %v3142_v9, %s2986_s11  ;;  %958 = vrot.lane.b32.xlu1 %v3142_v9, %s2983_s9 }
  0xe8   : > { %v582_v43 = vpop.permute.xlu0 %581  ;;  %v584_v4 = vpop.permute.xlu1 %583 }
  0xe9   : > { %666 = vst.msk [vmem:[#allocation2 + $0x60] sm:$0xff] %vm653_vm3, %v582_v43  ;;  %667 = vst.msk [vmem:[#allocation2 + $0x68] sm:$0xff] %vm653_vm3, %v584_v4 }
  0xea   : > { %1538 = vrot.lane.b32.xlu0 %v3145_v10, %s2986_s11  ;;  %1729 = vrot.lane.b32.xlu1 %v3375_v44, %s2987_s27 }
  0xec   : > { %v586_v25 = vpop.permute.xlu0 %585  ;;  %v588_v26 = vpop.permute.xlu1 %587 }
  0xed   : > { %668 = vst.msk [vmem:[#allocation2 + $0x70] sm:$0xff] %vm653_vm3, %v586_v25  ;;  %669 = vst.msk [vmem:[#allocation2 + $0x78] sm:$0xff] %vm653_vm3, %v588_v26 }
  0xee   : > { %960 = vrot.lane.b32.xlu0 %v3145_v10, %s2983_s9  ;;  %1151 = vrot.lane.b32.xlu1 %v3375_v44, %s2984_s21 }
  0xf0   : > { %v590_v9 = vpop.permute.xlu0 %589  ;;  %v592_v54 = vpop.permute.xlu1 %591 }
  0xf1   : > { %670 = vst.msk [vmem:[#allocation2 + $0x80] sm:$0xff] %vm653_vm3, %v590_v9  ;;  %671 = vst.msk [vmem:[#allocation2 + $0x88] sm:$0xff] %vm653_vm3, %v592_v54  ;;  %v2562_v54 = vld [vmem:[%s3105_s30 + $0xd9] sm:$0xff] }
  0xf2   : > { %1731 = vrot.lane.b32.xlu0 %v3378_v45, %s2987_s27  ;;  %1153 = vrot.lane.b32.xlu1 %v3378_v45, %s2984_s21 }
  0xf4   : > { %v594_v55 = vpop.permute.xlu0 %593  ;;  %v596_v56 = vpop.permute.xlu1 %595 }
  0xf5   : > { %672 = vst.msk [vmem:[#allocation2 + $0x90] sm:$0xff] %vm653_vm3, %v594_v55  ;;  %673 = vst.msk [vmem:[#allocation2 + $0x98] sm:$0xff] %vm653_vm3, %v596_v56 }
  0xf6   : > { %1347 = vrot.lane.b32.xlu0 %v3220_v27, %s2985_s29  ;;  %1349 = vrot.lane.b32.xlu1 %v3223_v28, %s2985_s29 }
  0xf8   : > { %v598_v10 = vpop.permute.xlu0 %597  ;;  %v600_v44 = vpop.permute.xlu1 %599 }
  0xf9   : > { %674 = vst.msk [vmem:[#allocation2 + $0xa0] sm:$0xff] %vm653_vm3, %v598_v10  ;;  %675 = vst.msk [vmem:[#allocation2 + $0xa8] sm:$0xff] %vm653_vm3, %v600_v44 }
  0xfa   : > { %1540 = vrot.lane.b32.xlu0 %v3152_v11, %s2986_s11  ;;  %962 = vrot.lane.b32.xlu1 %v3152_v11, %s2983_s9 }
  0xfc   : > { %v602_v45 = vpop.permute.xlu0 %601  ;;  %v604_v13 = vpop.permute.xlu1 %603 }
  0xfd   : > { %676 = vst.msk [vmem:[#allocation2 + $0xb0] sm:$0xff] %vm653_vm3, %v602_v45  ;;  %677 = vst.msk [vmem:[#allocation2 + $0xb8] sm:$0xff] %vm653_vm3, %v604_v13  ;;  %v2594_v13 = vld [vmem:[%s3105_s30 + $0xda] sm:$0xff] }
  0xfe   : > { %1542 = vrot.lane.b32.xlu0 %v3155_v12, %s2986_s11  ;;  %1733 = vrot.lane.b32.xlu1 %v3385_v46, %s2987_s27 }
 0x100   : > { %v606_v27 = vpop.permute.xlu0 %605  ;;  %v608_v28 = vpop.permute.xlu1 %607 }
 0x101   : > { %678 = vst.msk [vmem:[#allocation2 + $0xc0] sm:$0xff] %vm653_vm3, %v606_v27  ;;  %679 = vst.msk [vmem:[#allocation2 + $0xc8] sm:$0xff] %vm653_vm3, %v608_v28 }
 0x102   : > { %964 = vrot.lane.b32.xlu0 %v3155_v12, %s2983_s9  ;;  %1155 = vrot.lane.b32.xlu1 %v3385_v46, %s2984_s21 }
 0x104   : > { %v610_v11 = vpop.permute.xlu0 %609  ;;  %v612_v17 = vpop.permute.xlu1 %611 }
 0x105   : > { %680 = vst.msk [vmem:[#allocation2 + $0xd0] sm:$0xff] %vm653_vm3, %v610_v11  ;;  %681 = vst.msk [vmem:[#allocation2 + $0xd8] sm:$0xff] %vm653_vm3, %v612_v17 }
 0x106   : > { %1735 = vrot.lane.b32.xlu0 %v3388_v47, %s2987_s27  ;;  %1157 = vrot.lane.b32.xlu1 %v3388_v47, %s2984_s21 }
 0x108   : > { %v614_v57 = vpop.permute.xlu0 %613  ;;  %v616_v58 = vpop.permute.xlu1 %615 }
 0x109   : > { %682 = vst.msk [vmem:[#allocation2 + $0xe0] sm:$0xff] %vm653_vm3, %v614_v57  ;;  %683 = vst.msk [vmem:[#allocation2 + $0xe8] sm:$0xff] %vm653_vm3, %v616_v58 }
 0x10a   : > { %1351 = vrot.lane.b32.xlu0 %v3226_v29, %s2985_s29  ;;  %773 = vrot.lane.b32.xlu1 %v3226_v29, %s2982_s6 }
 0x10c   : > { %v618_v12 = vpop.permute.xlu0 %617  ;;  %v620_v46 = vpop.permute.xlu1 %619 }
 0x10d   : > { %684 = vst.msk [vmem:[#allocation2 + $0xf0] sm:$0xff] %vm653_vm3, %v618_v12  ;;  %685 = vst.msk [vmem:[#allocation2 + $0xf8] sm:$0xff] %vm653_vm3, %v620_v46 }
 0x10e   : > { %1353 = vrot.lane.b32.xlu0 %v3237_v32, %s2985_s29  ;;  %1544 = vrot.lane.b32.xlu1 %v3166_v15, %s2986_s11 }
 0x110   : > { %v754_v47 = vpop.permute.xlu0 %753  ;;  %v756_v59 = vpop.permute.xlu1 %755 }
 0x111   : > { %850 = vst.msk [vmem:[#allocation2] sm:$0xff] %vm849_vm4, %v754_v47  ;;  %851 = vst.msk [vmem:[#allocation2 + $0x8] sm:$0xff] %vm849_vm4, %v756_v59  ;;  %v2564_v59 = vld [vmem:[%s3105_s30 + $0xf1] sm:$0xff] }
 0x112   : > { %775 = vrot.lane.b32.xlu0 %v3237_v32, %s2982_s6  ;;  %966 = vrot.lane.b32.xlu1 %v3166_v15, %s2983_s9 }
 0x114   : > { %v758_v29 = vpop.permute.xlu0 %757  ;;  %v760_v20 = vpop.permute.xlu1 %759 }
 0x115   : > { %852 = vst.msk [vmem:[#allocation2 + $0x10] sm:$0xff] %vm849_vm4, %v758_v29  ;;  %853 = vst.msk [vmem:[#allocation2 + $0x18] sm:$0xff] %vm849_vm4, %v760_v20 }
 0x116   : > { %1546 = vrot.lane.b32.xlu0 %v3169_v16, %s2986_s11  ;;  %1737 = vrot.lane.b32.xlu1 %v3395_v48, %s2987_s27 }
 0x118   : > { %v762_v21 = vpop.permute.xlu0 %761  ;;  %v764_v60 = vpop.permute.xlu1 %763 }
 0x119   : > { %854 = vst.msk [vmem:[#allocation2 + $0x20] sm:$0xff] %vm849_vm4, %v762_v21  ;;  %855 = vst.msk [vmem:[#allocation2 + $0x28] sm:$0xff] %vm849_vm4, %v764_v60 }
 0x11a   : > { %968 = vrot.lane.b32.xlu0 %v3169_v16, %s2983_s9  ;;  %1159 = vrot.lane.b32.xlu1 %v3395_v48, %s2984_s21 }
 0x11c   : > { %v766_v15 = vpop.permute.xlu0 %765  ;;  %v768_v32 = vpop.permute.xlu1 %767 }
 0x11d   : > { %856 = vst.msk [vmem:[#allocation2 + $0x30] sm:$0xff] %vm849_vm4, %v766_v15  ;;  %857 = vst.msk [vmem:[#allocation2 + $0x38] sm:$0xff] %vm849_vm4, %v768_v32  ;;  %v2596_v32 = vld [vmem:[%s3105_s30 + $0xf2] sm:$0xff] }
 0x11e   : > { %1739 = vrot.lane.b32.xlu0 %v3398_v49, %s2987_s27  ;;  %1161 = vrot.lane.b32.xlu1 %v3398_v49, %s2984_s21  ;;  %v2464_v49 = vld [vmem:[%s3105_s30 + $0xa9] sm:$0xff] }
 0x120   : > { %v770_v61 = vpop.permute.xlu0 %769  ;;  %v772_v62 = vpop.permute.xlu1 %771 }
 0x121   : > { %858 = vst.msk [vmem:[#allocation2 + $0x40] sm:$0xff] %vm849_vm4, %v770_v61  ;;  %859 = vst.msk [vmem:[#allocation2 + $0x48] sm:$0xff] %vm849_vm4, %v772_v62 }
 0x122   : > { %1355 = vrot.lane.b32.xlu0 %v3240_v33, %s2985_s29  ;;  %777 = vrot.lane.b32.xlu1 %v3240_v33, %s2982_s6  ;;  %v2559_v33 = vld [vmem:[%s3105_s30 + $0xb1] sm:$0xff] }
 0x124   : > { %v947_v16 = vpop.permute.xlu0 %946  ;;  %v949_v48 = vpop.permute.xlu1 %948 }
 0x125   : > { %1043 = vst.msk [vmem:[#allocation2] sm:$0xff] %vm1042_vm5, %v947_v16  ;;  %1044 = vst.msk [vmem:[#allocation2 + $0x8] sm:$0xff] %vm1042_vm5, %v949_v48 }
 0x126   : > { %1357 = vrot.lane.b32.xlu0 %v3243_v34, %s2985_s29  ;;  %1548 = vrot.lane.b32.xlu1 %v3180_v19, %s2986_s11 }
 0x128   : > { %v1140_v5 = vpop.permute.xlu0 %1139  ;;  %v1142_v63 = vpop.permute.xlu1 %1141 }
 0x129   : > { %1236 = vst.msk [vmem:[#allocation2] sm:$0xff] %vm1235_vm6, %v1140_v5  ;;  %1237 = vst.msk [vmem:[#allocation2 + $0x8] sm:$0xff] %vm1235_vm6, %v1142_v63 }
 0x12a   : > { %779 = vrot.lane.b32.xlu0 %v3243_v34, %s2982_s6  ;;  %970 = vrot.lane.b32.xlu1 %v2464_v49, %s2983_s9 }
 0x12c   : > { %v1336_v14 = vpop.permute.xlu0 %1335  ;;  %v1338_v18 = vpop.permute.xlu1 %1337 }
 0x12d   : > { %1432 = vst.msk [vmem:[#allocation2] sm:$0xff] %vm1431_vm7, %v1336_v14  ;;  %1433 = vst.msk [vmem:[#allocation2 + $0x8] sm:$0xff] %vm1431_vm7, %v1338_v18 }
 0x12e   : > { %1550 = vrot.lane.b32.xlu0 %v2559_v33, %s2986_s11  ;;  %1741 = vrot.lane.b32.xlu1 %v3405_v50, %s2987_s27 }
 0x130   : > { %v1529_v19 = vpop.permute.xlu0 %1528  ;;  %v951_v0 = vpop.permute.xlu1 %950 }
 0x131   : > { %1625 = vst.msk [vmem:[#allocation2] sm:$0xff] %vm1624_vm8, %v1529_v19  ;;  %v2566_v19 = vld [vmem:[%s3105_s30 + $0x109] sm:$0xff] }
 0x132   : > { %1045 = vst.msk [vmem:[#allocation2 + $0x10] sm:$0xff] %vm1042_vm5, %v951_v0  ;;  %972 = vrot.lane.b32.xlu0 %v2559_v33, %s2983_s9  ;;  %1163 = vrot.lane.b32.xlu1 %v3405_v50, %s2984_s21  ;;  %v2560_v50 = vld [vmem:[%s3105_s30 + $0xc1] sm:$0xff] }
 0x134   : > { %v1531_v34 = vpop.permute.xlu0 %1530  ;;  %v1722_v1 = vpop.permute.xlu1 %1721 }
 0x135   : > { %1626 = vst.msk [vmem:[#allocation2 + $0x8] sm:$0xff] %vm1624_vm8, %v1531_v34 }
 0x136   : > { %1818 = vst.msk [vmem:[#allocation2] sm:$0xff] %vm1817_vm9, %v1722_v1  ;;  %1743 = vrot.lane.b32.xlu0 %v3408_v51, %s2987_s27  ;;  %1165 = vrot.lane.b32.xlu1 %v3408_v51, %s2984_s21 }
 0x138   : > { %v953_v6 = vpop.permute.xlu0 %952  ;;  %v1144_v22 = vpop.permute.xlu1 %1143 }
 0x139   : > { %1046 = vst.msk [vmem:[#allocation2 + $0x18] sm:$0xff] %vm1042_vm5, %v953_v6 }
 0x13a   : > { %1238 = vst.msk [vmem:[#allocation2 + $0x10] sm:$0xff] %vm1235_vm6, %v1144_v22  ;;  %1359 = vrot.lane.b32.xlu0 %v3255_v35, %s2985_s29  ;;  %781 = vrot.lane.b32.xlu1 %v3255_v35, %s2982_s6  ;;  %v2561_v35 = vld [vmem:[%s3105_s30 + $0xc9] sm:$0xff] }
 0x13b   : > { %v2598_v22 = vld [vmem:[%s3105_s30 + $0x10a] sm:$0xff] }
 0x13c   : > { %v1724_v30 = vpop.permute.xlu0 %1723  ;;  %v1146_v3 = vpop.permute.xlu1 %1145 }
 0x13d   : > { %v1850_v23 = vld [vmem:[#allocation2] sm:$0xff]  ;;  %1819 = vst.msk [vmem:[#allocation2 + $0x8] sm:$0xff] %vm1817_vm9, %v1724_v30 }
 0x13e   : > { %1239 = vst.msk [vmem:[#allocation2 + $0x18] sm:$0xff] %vm1235_vm6, %v1146_v3  ;;  %2700 = vmatprep.mubr.f32.mxu0 %v1850_v23  ;;  %1361 = vrot.lane.b32.xlu0 %v3258_v36, %s2985_s29 }
 0x13f   : > { %1552 = vrot.lane.b32.xlu1 %v2560_v50, %s2986_s11 }
 0x140   : > { %v1340_v51 = vpop.permute.xlu0 %1339  ;;  %v1342_v24 = vpop.permute.xlu1 %1341 }
 0x141   : > { %1434 = vst.msk [vmem:[#allocation2 + $0x10] sm:$0xff] %vm1431_vm7, %v1340_v51  ;;  %1435 = vst.msk [vmem:[#allocation2 + $0x18] sm:$0xff] %vm1431_vm7, %v1342_v24 }
 0x142   : > { %783 = vrot.lane.b32.xlu0 %v3258_v36, %s2982_s6  ;;  %v2593_v36 = vld [vmem:[%s3105_s30 + $0xca] sm:$0xff] }
 0x143   : > { %974 = vrot.lane.b32.xlu1 %v2560_v50, %s2983_s9 }
 0x144   : > { %v1533_v52 = vpop.permute.xlu0 %1532  ;;  %v955_v53 = vpop.permute.xlu1 %954  ;;  %v1851_v2 = vld [vmem:[#allocation2 + $0x8] sm:$0xff] }
 0x145   : > { %1627 = vst.msk [vmem:[#allocation2 + $0x10] sm:$0xff] %vm1624_vm8, %v1533_v52  ;;  %2701 = vmatmul.mubr.f32.vlgmr.msra.gmra.mrb[0].mxu0 %v1851_v2 }
 0x146   : > { %1047 = vst.msk [vmem:[#allocation2 + $0x20] sm:$0xff] %vm1042_vm5, %v955_v53  ;;  %1554 = vrot.lane.b32.xlu0 %v2561_v35, %s2986_s11 }
 0x147   : > { %1745 = vrot.lane.b32.xlu1 %v2592_v7, %s2987_s27 }
 0x148   : > { %v1535_v8 = vpop.permute.xlu0 %1534  ;;  %v1726_v31 = vpop.permute.xlu1 %1725 }
 0x149   : > { %1628 = vst.msk [vmem:[#allocation2 + $0x18] sm:$0xff] %vm1624_vm8, %v1535_v8  ;;  %v2537_v8 = vld [vmem:[%s3105_s30 + $0x128] sm:$0xff] }
 0x14a   : > { %1820 = vst.msk [vmem:[#allocation2 + $0x10] sm:$0xff] %vm1817_vm9, %v1726_v31  ;;  %976 = vrot.lane.b32.xlu0 %v2561_v35, %s2983_s9  ;;  %v2568_v31 = vld [vmem:[%s3105_s30 + $0x121] sm:$0xff] }
 0x14b   : > { %1167 = vrot.lane.b32.xlu1 %v2592_v7, %s2984_s21  ;;  %v2536_v7 = vld [vmem:[%s3105_s30 + $0x120] sm:$0xff] }
 0x14c   : > { %v957_v43 = vpop.permute.xlu0 %956  ;;  %v1148_v4 = vpop.permute.xlu1 %1147 }
 0x14d   : > { %1048 = vst.msk [vmem:[#allocation2 + $0x28] sm:$0xff] %vm1042_vm5, %v957_v43 }
 0x14e   : > { %1240 = vst.msk [vmem:[#allocation2 + $0x20] sm:$0xff] %vm1235_vm6, %v1148_v4  ;;  %1747 = vrot.lane.b32.xlu0 %v2593_v36, %s2987_s27 }
 0x14f   : > { %1169 = vrot.lane.b32.xlu1 %v2593_v36, %s2984_s21 }
 0x150   : > { %v1728_v25 = vpop.permute.xlu0 %1727  ;;  %v1150_v26 = vpop.permute.xlu1 %1149 }
 0x151   : > { %v1852_v9 = vld [vmem:[#allocation2 + $0x10] sm:$0xff]  ;;  %1821 = vst.msk [vmem:[#allocation2 + $0x18] sm:$0xff] %vm1817_vm9, %v1728_v25 }
 0x152   : > { %1241 = vst.msk [vmem:[#allocation2 + $0x28] sm:$0xff] %vm1235_vm6, %v1150_v26  ;;  %2703 = vmatprep.mubr.f32.mxu0 %v1852_v9  ;;  %1363 = vrot.lane.b32.xlu0 %v3265_v37, %s2985_s29  ;;  %v2569_v26 = vld [vmem:[%s3105_s30 + $0x129] sm:$0xff] }
 0x153   : > { %785 = vrot.lane.b32.xlu1 %v3265_v37, %s2982_s6  ;;  %v2563_v37 = vld [vmem:[%s3105_s30 + $0xe1] sm:$0xff] }
 0x154   : > { %v1344_v55 = vpop.permute.xlu0 %1343  ;;  %v1346_v56 = vpop.permute.xlu1 %1345  ;;  %v2600_v9 = vld [vmem:[%s3105_s30 + $0x122] sm:$0xff] }
 0x155   : > { %1436 = vst.msk [vmem:[#allocation2 + $0x20] sm:$0xff] %vm1431_vm7, %v1344_v55  ;;  %1437 = vst.msk [vmem:[#allocation2 + $0x28] sm:$0xff] %vm1431_vm7, %v1346_v56 }
 0x156   : > { %1365 = vrot.lane.b32.xlu0 %v3268_v38, %s2985_s29 }
 0x157   : > { %1556 = vrot.lane.b32.xlu1 %v2562_v54, %s2986_s11 }
 0x158   : > { %v1537_v10 = vpop.permute.xlu0 %1536  ;;  %v959_v44 = vpop.permute.xlu1 %958  ;;  %v1853_v45 = vld [vmem:[#allocation2 + $0x18] sm:$0xff] }
 0x159   : > { %1629 = vst.msk [vmem:[#allocation2 + $0x20] sm:$0xff] %vm1624_vm8, %v1537_v10  ;;  %2704 = vmatmul.mubr.f32.gmra.mrb[2].mxu0 %v1853_v45  ;;  %v2601_v45 = vld [vmem:[%s3105_s30 + $0x12a] sm:$0xff] }
 0x15a   : > { %1049 = vst.msk [vmem:[#allocation2 + $0x30] sm:$0xff] %vm1042_vm5, %v959_v44  ;;  %787 = vrot.lane.b32.xlu0 %v3268_v38, %s2982_s6  ;;  %v2595_v38 = vld [vmem:[%s3105_s30 + $0xe2] sm:$0xff] }
 0x15b   : > { %978 = vrot.lane.b32.xlu1 %v2562_v54, %s2983_s9 }
 0x15c   : > { %v1539_v27 = vpop.permute.xlu0 %1538  ;;  %v1730_v28 = vpop.permute.xlu1 %1729 }
 0x15d   : > { %1630 = vst.msk [vmem:[#allocation2 + $0x28] sm:$0xff] %vm1624_vm8, %v1539_v27  ;;  %v2538_v27 = vld [vmem:[%s3105_s30 + $0x138] sm:$0xff] }
 0x15e   : > { %1822 = vst.msk [vmem:[#allocation2 + $0x20] sm:$0xff] %vm1817_vm9, %v1730_v28  ;;  %1558 = vrot.lane.b32.xlu0 %v2563_v37, %s2986_s11 }
 0x15f   : > { %1749 = vrot.lane.b32.xlu1 %v2594_v13, %s2987_s27 }
 0x160   : > { %v961_v11 = vpop.permute.xlu0 %960  ;;  %v1152_v17 = vpop.permute.xlu1 %1151 }
 0x161   : > { %1050 = vst.msk [vmem:[#allocation2 + $0x38] sm:$0xff] %vm1042_vm5, %v961_v11 }
 0x162   : > { %1242 = vst.msk [vmem:[#allocation2 + $0x30] sm:$0xff] %vm1235_vm6, %v1152_v17  ;;  %980 = vrot.lane.b32.xlu0 %v2563_v37, %s2983_s9 }
 0x163   : > { %1171 = vrot.lane.b32.xlu1 %v2594_v13, %s2984_s21 }
 0x164   : > { %v1732_v57 = vpop.permute.xlu0 %1731  ;;  %v1154_v58 = vpop.permute.xlu1 %1153 }
 0x165   : > { %v1854_v12 = vld [vmem:[#allocation2 + $0x20] sm:$0xff]  ;;  %1823 = vst.msk [vmem:[#allocation2 + $0x28] sm:$0xff] %vm1817_vm9, %v1732_v57 }
 0x166   : > { %1243 = vst.msk [vmem:[#allocation2 + $0x38] sm:$0xff] %vm1235_vm6, %v1154_v58  ;;  %2706 = vmatprep.mubr.f32.mxu0 %v1854_v12  ;;  %1751 = vrot.lane.b32.xlu0 %v2595_v38, %s2987_s27  ;;  %v2570_v57 = vld [vmem:[%s3105_s30 + $0x139] sm:$0xff] }
 0x167   : > { %1173 = vrot.lane.b32.xlu1 %v2595_v38, %s2984_s21  ;;  %v2539_v38 = vld [vmem:[%s3105_s30 + $0x140] sm:$0xff] }
 0x168   : > { %v1348_v46 = vpop.permute.xlu0 %1347  ;;  %v1350_v47 = vpop.permute.xlu1 %1349 }
 0x169   : > { %1438 = vst.msk [vmem:[#allocation2 + $0x30] sm:$0xff] %vm1431_vm7, %v1348_v46  ;;  %1439 = vst.msk [vmem:[#allocation2 + $0x38] sm:$0xff] %vm1431_vm7, %v1350_v47 }
 0x16a   : > { %1367 = vrot.lane.b32.xlu0 %v3271_v39, %s2985_s29 }
 0x16b   : > { %789 = vrot.lane.b32.xlu1 %v3271_v39, %s2982_s6  ;;  %v2565_v39 = vld [vmem:[%s3105_s30 + $0xf9] sm:$0xff] }
 0x16c   : > { %v1541_v29 = vpop.permute.xlu0 %1540  ;;  %v963_v20 = vpop.permute.xlu1 %962  ;;  %v1855_v21 = vld [vmem:[#allocation2 + $0x28] sm:$0xff] }
 0x16d   : > { %1631 = vst.msk [vmem:[#allocation2 + $0x30] sm:$0xff] %vm1624_vm8, %v1541_v29  ;;  %2707 = vmatmul.mubr.f32.gmra.mrb[4].mxu0 %v1855_v21  ;;  %v2602_v29 = vld [vmem:[%s3105_s30 + $0x13a] sm:$0xff] }
 0x16e   : > { %1051 = vst.msk [vmem:[#allocation2 + $0x40] sm:$0xff] %vm1042_vm5, %v963_v20  ;;  %1369 = vrot.lane.b32.xlu0 %v3280_v40, %s2985_s29 }
 0x16f   : > { %1560 = vrot.lane.b32.xlu1 %v2564_v59, %s2986_s11 }
 0x170   : > { %v1543_v60 = vpop.permute.xlu0 %1542  ;;  %v1734_v15 = vpop.permute.xlu1 %1733 }
 0x171   : > { %1632 = vst.msk [vmem:[#allocation2 + $0x38] sm:$0xff] %vm1624_vm8, %v1543_v60 }
 0x172   : > { %1824 = vst.msk [vmem:[#allocation2 + $0x30] sm:$0xff] %vm1817_vm9, %v1734_v15  ;;  %791 = vrot.lane.b32.xlu0 %v3280_v40, %s2982_s6  ;;  %v2597_v40 = vld [vmem:[%s3105_s30 + $0xfa] sm:$0xff] }
 0x173   : > { %982 = vrot.lane.b32.xlu1 %v2564_v59, %s2983_s9  ;;  %v2571_v59 = vld [vmem:[%s3105_s30 + $0x141] sm:$0xff] }
 0x174   : > { %v965_v61 = vpop.permute.xlu0 %964  ;;  %v1156_v62 = vpop.permute.xlu1 %1155 }
 0x175   : > { %1052 = vst.msk [vmem:[#allocation2 + $0x48] sm:$0xff] %vm1042_vm5, %v965_v61 }
 0x176   : > { %1244 = vst.msk [vmem:[#allocation2 + $0x40] sm:$0xff] %vm1235_vm6, %v1156_v62  ;;  %1562 = vrot.lane.b32.xlu0 %v2565_v39, %s2986_s11 }
 0x177   : > { %1753 = vrot.lane.b32.xlu1 %v2596_v32, %s2987_s27 }
 0x178   : > { %v1736_v16 = vpop.permute.xlu0 %1735  ;;  %v1158_v48 = vpop.permute.xlu1 %1157 }
 0x179   : > { %v1856_v49 = vld [vmem:[#allocation2 + $0x30] sm:$0xff]  ;;  %1825 = vst.msk [vmem:[#allocation2 + $0x38] sm:$0xff] %vm1817_vm9, %v1736_v16 }
 0x17a   : > { %1245 = vst.msk [vmem:[#allocation2 + $0x48] sm:$0xff] %vm1235_vm6, %v1158_v48  ;;  %2709 = vmatprep.mubr.f32.mxu0 %v1856_v49  ;;  %984 = vrot.lane.b32.xlu0 %v2565_v39, %s2983_s9  ;;  %v2540_v16 = vld [vmem:[%s3105_s30 + $0x150] sm:$0xff] }
 0x17b   : > { %1175 = vrot.lane.b32.xlu1 %v2596_v32, %s2984_s21  ;;  %v2603_v32 = vld [vmem:[%s3105_s30 + $0x142] sm:$0xff] }
 0x17c   : > { %v1352_v5 = vpop.permute.xlu0 %1351  ;;  %v774_v63 = vpop.permute.xlu1 %773 }
 0x17d   : > { %1440 = vst.msk [vmem:[#allocation2 + $0x40] sm:$0xff] %vm1431_vm7, %v1352_v5  ;;  %v2541_v5 = vld [vmem:[%s3105_s30 + $0x158] sm:$0xff] }
 0x17e   : > { %860 = vst.msk [vmem:[#allocation2 + $0x50] sm:$0xff] %vm849_vm4, %v774_v63  ;;  %1755 = vrot.lane.b32.xlu0 %v2597_v40, %s2987_s27  ;;  %v2572_v63 = vld [vmem:[%s3105_s30 + $0x151] sm:$0xff] }
 0x17f   : > { %1177 = vrot.lane.b32.xlu1 %v2597_v40, %s2984_s21 }
 0x180   : > { %v1354_v33 = vpop.permute.xlu0 %1353  ;;  %v1545_v14 = vpop.permute.xlu1 %1544  ;;  %v1857_v18 = vld [vmem:[#allocation2 + $0x38] sm:$0xff] }
 0x181   : > { %1441 = vst.msk [vmem:[#allocation2 + $0x48] sm:$0xff] %vm1431_vm7, %v1354_v33  ;;  %2710 = vmatmul.mubr.f32.gmra.mrb[6].mxu0 %v1857_v18 }
 0x182   : > { %1633 = vst.msk [vmem:[#allocation2 + $0x40] sm:$0xff] %vm1624_vm8, %v1545_v14  ;;  %1371 = vrot.lane.b32.xlu0 %v3283_v41, %s2985_s29 }
 0x183   : > { %793 = vrot.lane.b32.xlu1 %v3283_v41, %s2982_s6  ;;  %v2567_v41 = vld [vmem:[%s3105_s30 + $0x111] sm:$0xff] }
 0x184   : > { %v776_v0 = vpop.permute.xlu0 %775  ;;  %v967_v34 = vpop.permute.xlu1 %966 }
 0x185   : > { %861 = vst.msk [vmem:[#allocation2 + $0x58] sm:$0xff] %vm849_vm4, %v776_v0  ;;  %v2573_v0 = vld [vmem:[%s3105_s30 + $0x159] sm:$0xff] }
 0x186   : > { %1053 = vst.msk [vmem:[#allocation2 + $0x50] sm:$0xff] %vm1042_vm5, %v967_v34  ;;  %1373 = vrot.lane.b32.xlu0 %v3286_v42, %s2985_s29  ;;  %v2604_v34 = vld [vmem:[%s3105_s30 + $0x152] sm:$0xff] }
 0x187   : > { %1564 = vrot.lane.b32.xlu1 %v2566_v19, %s2986_s11 }
 0x188   : > { %v1547_v1 = vpop.permute.xlu0 %1546  ;;  %v1738_v6 = vpop.permute.xlu1 %1737 }
 0x189   : > { %1634 = vst.msk [vmem:[#allocation2 + $0x48] sm:$0xff] %vm1624_vm8, %v1547_v1 }
 0x18a   : > { %1826 = vst.msk [vmem:[#allocation2 + $0x40] sm:$0xff] %vm1817_vm9, %v1738_v6  ;;  %795 = vrot.lane.b32.xlu0 %v3286_v42, %s2982_s6  ;;  %v2599_v42 = vld [vmem:[%s3105_s30 + $0x112] sm:$0xff] }
 0x18b   : > { %986 = vrot.lane.b32.xlu1 %v2566_v19, %s2983_s9 }
 0x18c   : > { %v969_v50 = vpop.permute.xlu0 %968  ;;  %v1160_v30 = vpop.permute.xlu1 %1159 }
 0x18d   : > { %1054 = vst.msk [vmem:[#allocation2 + $0x58] sm:$0xff] %vm1042_vm5, %v969_v50 }
 0x18e   : > { %1246 = vst.msk [vmem:[#allocation2 + $0x50] sm:$0xff] %vm1235_vm6, %v1160_v30  ;;  %1566 = vrot.lane.b32.xlu0 %v2567_v41, %s2986_s11  ;;  %v2605_v30 = vld [vmem:[%s3105_s30 + $0x15a] sm:$0xff] }
 0x18f   : > { %1757 = vrot.lane.b32.xlu1 %v2598_v22, %s2987_s27 }
 0x190   : > { %v1740_v3 = vpop.permute.xlu0 %1739  ;;  %v1162_v23 = vpop.permute.xlu1 %1161 }
 0x191   : > { %v1858_v51 = vld [vmem:[#allocation2 + $0x40] sm:$0xff]  ;;  %1827 = vst.msk [vmem:[#allocation2 + $0x48] sm:$0xff] %vm1817_vm9, %v1740_v3 }
 0x192   : > { %1247 = vst.msk [vmem:[#allocation2 + $0x58] sm:$0xff] %vm1235_vm6, %v1162_v23  ;;  %2712 = vmatprep.mubr.f32.mxu0 %v1858_v51  ;;  %988 = vrot.lane.b32.xlu0 %v2567_v41, %s2983_s9  ;;  %v2542_v51 = vld [vmem:[%s3105_s30 + $0x168] sm:$0xff] }
 0x193   : > { %1179 = vrot.lane.b32.xlu1 %v2598_v22, %s2984_s21 }
 0x194   : > { %v1356_v24 = vpop.permute.xlu0 %1355  ;;  %v778_v35 = vpop.permute.xlu1 %777 }
 0x195   : > { %1442 = vst.msk [vmem:[#allocation2 + $0x50] sm:$0xff] %vm1431_vm7, %v1356_v24 }
 0x196   : > { %862 = vst.msk [vmem:[#allocation2 + $0x60] sm:$0xff] %vm849_vm4, %v778_v35  ;;  %1759 = vrot.lane.b32.xlu0 %v2599_v42, %s2987_s27 }
 0x197   : > { %1181 = vrot.lane.b32.xlu1 %v2599_v42, %s2984_s21 }
 0x198   : > { %v1358_v52 = vpop.permute.xlu0 %1357  ;;  %v1549_v53 = vpop.permute.xlu1 %1548  ;;  %v1859_v2 = vld [vmem:[#allocation2 + $0x48] sm:$0xff] }
 0x199   : > { %1443 = vst.msk [vmem:[#allocation2 + $0x58] sm:$0xff] %vm1431_vm7, %v1358_v52  ;;  %2713 = vmatmul.mubr.f32.gmra.mrb[8].mxu0 %v1859_v2  ;;  %v2574_v52 = vld [vmem:[%s3105_s30 + $0x169] sm:$0xff] }
 0x19a   : > { %1635 = vst.msk [vmem:[#allocation2 + $0x50] sm:$0xff] %vm1624_vm8, %v1549_v53  ;;  %1375 = vrot.lane.b32.xlu0 %v2536_v7, %s2985_s29 }
 0x19b   : > { %797 = vrot.lane.b32.xlu1 %v2536_v7, %s2982_s6  ;;  %v2543_v7 = vld [vmem:[%s3105_s30 + $0x170] sm:$0xff] }
 0x19c   : > { %v780_v36 = vpop.permute.xlu0 %779  ;;  %v971_v43 = vpop.permute.xlu1 %970 }
 0x19d   : > { %863 = vst.msk [vmem:[#allocation2 + $0x68] sm:$0xff] %vm849_vm4, %v780_v36  ;;  %v2575_v36 = vld [vmem:[%s3105_s30 + $0x171] sm:$0xff] }
 0x19e   : > { %1055 = vst.msk [vmem:[#allocation2 + $0x60] sm:$0xff] %vm1042_vm5, %v971_v43  ;;  %1377 = vrot.lane.b32.xlu0 %v2537_v8, %s2985_s29  ;;  %v2606_v43 = vld [vmem:[%s3105_s30 + $0x16a] sm:$0xff] }
 0x19f   : > { %1568 = vrot.lane.b32.xlu1 %v2568_v31, %s2986_s11 }
 0x1a0   : > { %v1551_v4 = vpop.permute.xlu0 %1550  ;;  %v1742_v25 = vpop.permute.xlu1 %1741 }
 0x1a1   : > { %1636 = vst.msk [vmem:[#allocation2 + $0x58] sm:$0xff] %vm1624_vm8, %v1551_v4 }
 0x1a2   : > { %1828 = vst.msk [vmem:[#allocation2 + $0x50] sm:$0xff] %vm1817_vm9, %v1742_v25  ;;  %799 = vrot.lane.b32.xlu0 %v2537_v8, %s2982_s6 }
 0x1a3   : > { %990 = vrot.lane.b32.xlu1 %v2568_v31, %s2983_s9 }
 0x1a4   : > { %v973_v54 = vpop.permute.xlu0 %972  ;;  %v1164_v55 = vpop.permute.xlu1 %1163 }
 0x1a5   : > { %1056 = vst.msk [vmem:[#allocation2 + $0x68] sm:$0xff] %vm1042_vm5, %v973_v54 }
 0x1a6   : > { %1248 = vst.msk [vmem:[#allocation2 + $0x60] sm:$0xff] %vm1235_vm6, %v1164_v55  ;;  %1570 = vrot.lane.b32.xlu0 %v2569_v26, %s2986_s11  ;;  %v2607_v55 = vld [vmem:[%s3105_s30 + $0x172] sm:$0xff] }
 0x1a7   : > { %1761 = vrot.lane.b32.xlu1 %v2600_v9, %s2987_s27 }
 0x1a8   : > { %v1744_v56 = vpop.permute.xlu0 %1743  ;;  %v1166_v10 = vpop.permute.xlu1 %1165 }
 0x1a9   : > { %v1860_v44 = vld [vmem:[#allocation2 + $0x50] sm:$0xff]  ;;  %1829 = vst.msk [vmem:[#allocation2 + $0x58] sm:$0xff] %vm1817_vm9, %v1744_v56 }
 0x1aa   : > { %1249 = vst.msk [vmem:[#allocation2 + $0x68] sm:$0xff] %vm1235_vm6, %v1166_v10  ;;  %2715 = vmatprep.mubr.f32.mxu0 %v1860_v44  ;;  %992 = vrot.lane.b32.xlu0 %v2569_v26, %s2983_s9  ;;  %v2544_v44 = vld [vmem:[%s3105_s30 + $0x180] sm:$0xff] }
 0x1ab   : > { %1183 = vrot.lane.b32.xlu1 %v2600_v9, %s2984_s21 }
 0x1ac   : > { %v1360_v37 = vpop.permute.xlu0 %1359  ;;  %v782_v13 = vpop.permute.xlu1 %781 }
 0x1ad   : > { %1444 = vst.msk [vmem:[#allocation2 + $0x60] sm:$0xff] %vm1431_vm7, %v1360_v37 }
 0x1ae   : > { %864 = vst.msk [vmem:[#allocation2 + $0x70] sm:$0xff] %vm849_vm4, %v782_v13  ;;  %1763 = vrot.lane.b32.xlu0 %v2601_v45, %s2987_s27 }
 0x1af   : > { %1185 = vrot.lane.b32.xlu1 %v2601_v45, %s2984_s21 }
 0x1b0   : > { %v1362_v28 = vpop.permute.xlu0 %1361  ;;  %v1861_v17 = vld [vmem:[#allocation2 + $0x58] sm:$0xff] }
 0x1b1   : > { %v1553_v11 = vpop.permute.xlu1 %1552  ;;  %1445 = vst.msk [vmem:[#allocation2 + $0x68] sm:$0xff] %vm1431_vm7, %v1362_v28  ;;  %2716 = vmatmul.mubr.f32.gmra.mrb[10].mxu0 %v1861_v17  ;;  %v2576_v28 = vld [vmem:[%s3105_s30 + $0x181] sm:$0xff] }
 0x1b2   : > { %1637 = vst.msk [vmem:[#allocation2 + $0x60] sm:$0xff] %vm1624_vm8, %v1553_v11  ;;  %1379 = vrot.lane.b32.xlu0 %v2538_v27, %s2985_s29 }
 0x1b3   : > { %801 = vrot.lane.b32.xlu1 %v2538_v27, %s2982_s6  ;;  %v2545_v27 = vld [vmem:[%s3105_s30 + $0x188] sm:$0xff] }
 0x1b4   : > { %v784_v58 = vpop.permute.xlu0 %783 }
 0x1b5   : > { %v975_v12 = vpop.permute.xlu1 %974  ;;  %865 = vst.msk [vmem:[#allocation2 + $0x78] sm:$0xff] %vm849_vm4, %v784_v58  ;;  %v2577_v58 = vld [vmem:[%s3105_s30 + $0x189] sm:$0xff] }
 0x1b6   : > { %1057 = vst.msk [vmem:[#allocation2 + $0x70] sm:$0xff] %vm1042_vm5, %v975_v12  ;;  %1381 = vrot.lane.b32.xlu0 %v2539_v38, %s2985_s29  ;;  %v2608_v12 = vld [vmem:[%s3105_s30 + $0x182] sm:$0xff] }
 0x1b7   : > { %1572 = vrot.lane.b32.xlu1 %v2570_v57, %s2986_s11 }
 0x1b8   : > { %v1555_v46 = vpop.permute.xlu0 %1554 }
 0x1b9   : > { %v1746_v47 = vpop.permute.xlu1 %1745  ;;  %1638 = vst.msk [vmem:[#allocation2 + $0x68] sm:$0xff] %vm1624_vm8, %v1555_v46 }
 0x1ba   : > { %1830 = vst.msk [vmem:[#allocation2 + $0x60] sm:$0xff] %vm1817_vm9, %v1746_v47  ;;  %803 = vrot.lane.b32.xlu0 %v2539_v38, %s2982_s6 }
 0x1bb   : > { %994 = vrot.lane.b32.xlu1 %v2570_v57, %s2983_s9 }
 0x1bc   : > { %v977_v20 = vpop.permute.xlu0 %976 }
 0x1bd   : > { %v1168_v21 = vpop.permute.xlu1 %1167  ;;  %1058 = vst.msk [vmem:[#allocation2 + $0x78] sm:$0xff] %vm1042_vm5, %v977_v20 }
 0x1be   : > { %1250 = vst.msk [vmem:[#allocation2 + $0x70] sm:$0xff] %vm1235_vm6, %v1168_v21  ;;  %1574 = vrot.lane.b32.xlu0 %v2571_v59, %s2986_s11  ;;  %v2609_v21 = vld [vmem:[%s3105_s30 + $0x18a] sm:$0xff] }
 0x1bf   : > { %1765 = vrot.lane.b32.xlu1 %v2602_v29, %s2987_s27 }
 0x1c0   : > { %v1748_v60 = vpop.permute.xlu0 %1747 }
 0x1c1   : > { %v1170_v15 = vpop.permute.xlu1 %1169  ;;  %v1862_v39 = vld [vmem:[#allocation2 + $0x60] sm:$0xff]  ;;  %1831 = vst.msk [vmem:[#allocation2 + $0x68] sm:$0xff] %vm1817_vm9, %v1748_v60 }
 0x1c2   : > { %1251 = vst.msk [vmem:[#allocation2 + $0x78] sm:$0xff] %vm1235_vm6, %v1170_v15  ;;  %2718 = vmatprep.mubr.f32.mxu0 %v1862_v39  ;;  %996 = vrot.lane.b32.xlu0 %v2571_v59, %s2983_s9  ;;  %v2546_v39 = vld [vmem:[%s3105_s30 + $0x198] sm:$0xff] }
 0x1c3   : > { %1187 = vrot.lane.b32.xlu1 %v2602_v29, %s2984_s21 }
 0x1c4   : > { %v1364_v61 = vpop.permute.xlu0 %1363 }
 0x1c5   : > { %v786_v62 = vpop.permute.xlu1 %785  ;;  %1446 = vst.msk [vmem:[#allocation2 + $0x70] sm:$0xff] %vm1431_vm7, %v1364_v61 }
 0x1c6   : > { %866 = vst.msk [vmem:[#allocation2 + $0x80] sm:$0xff] %vm849_vm4, %v786_v62  ;;  %1767 = vrot.lane.b32.xlu0 %v2603_v32, %s2987_s27 }
 0x1c7   : > { %1189 = vrot.lane.b32.xlu1 %v2603_v32, %s2984_s21  ;;  %v2547_v32 = vld [vmem:[%s3105_s30 + $0x1a0] sm:$0xff] }
 0x1c8   : > { %v1366_v48 = vpop.permute.xlu0 %1365  ;;  %v1863_v40 = vld [vmem:[#allocation2 + $0x68] sm:$0xff] }
 0x1c9   : > { %v1557_v49 = vpop.permute.xlu1 %1556  ;;  %1447 = vst.msk [vmem:[#allocation2 + $0x78] sm:$0xff] %vm1431_vm7, %v1366_v48  ;;  %2719 = vmatmul.mubr.f32.gmra.mrb[12].mxu0 %v1863_v40  ;;  %v2578_v48 = vld [vmem:[%s3105_s30 + $0x199] sm:$0xff] }
 0x1ca   : > { %1639 = vst.msk [vmem:[#allocation2 + $0x70] sm:$0xff] %vm1624_vm8, %v1557_v49  ;;  %1383 = vrot.lane.b32.xlu0 %v2540_v16, %s2985_s29  ;;  %v2579_v49 = vld [vmem:[%s3105_s30 + $0x1a1] sm:$0xff] }
 0x1cb   : > { %805 = vrot.lane.b32.xlu1 %v2540_v16, %s2982_s6 }
 0x1cc   : > { %v788_v33 = vpop.permute.xlu0 %787 }
 0x1cd   : > { %v979_v14 = vpop.permute.xlu1 %978  ;;  %867 = vst.msk [vmem:[#allocation2 + $0x88] sm:$0xff] %vm849_vm4, %v788_v33  ;;  %v2611_v33 = vld [vmem:[%s3105_s30 + $0x1a2] sm:$0xff] }
 0x1ce   : > { %1059 = vst.msk [vmem:[#allocation2 + $0x80] sm:$0xff] %vm1042_vm5, %v979_v14  ;;  %1385 = vrot.lane.b32.xlu0 %v2541_v5, %s2985_s29 }
 0x1cf   : > { %1576 = vrot.lane.b32.xlu1 %v2572_v63, %s2986_s11 }
 0x1d0   : > { %v1559_v18 = vpop.permute.xlu0 %1558 }
 0x1d1   : > { %v1750_v19 = vpop.permute.xlu1 %1749  ;;  %1640 = vst.msk [vmem:[#allocation2 + $0x78] sm:$0xff] %vm1624_vm8, %v1559_v18 }
 0x1d2   : > { %1832 = vst.msk [vmem:[#allocation2 + $0x70] sm:$0xff] %vm1817_vm9, %v1750_v19  ;;  %807 = vrot.lane.b32.xlu0 %v2541_v5, %s2982_s6 }
 0x1d3   : > { %998 = vrot.lane.b32.xlu1 %v2572_v63, %s2983_s9  ;;  %v2610_v63 = vld [vmem:[%s3105_s30 + $0x19a] sm:$0xff]  ;;  %s2619_s30 = sshll.u32 %s2969_s15, 12 }
 0x1d4   : > { %v981_v1 = vpop.permute.xlu0 %980  ;;  %s4128_s7 = scalar_lea.hbm %s4214_s2, %s2619_s30 }
 0x1d5   : > { %v1172_v6 = vpop.permute.xlu1 %1171  ;;  %1060 = vst.msk [vmem:[#allocation2 + $0x88] sm:$0xff] %vm1042_vm5, %v981_v1 }
 0x1d6   : > { %1252 = vst.msk [vmem:[#allocation2 + $0x80] sm:$0xff] %vm1235_vm6, %v1172_v6  ;;  %1578 = vrot.lane.b32.xlu0 %v2573_v0, %s2986_s11 }
 0x1d7   : > { %1769 = vrot.lane.b32.xlu1 %v2604_v34, %s2987_s27 }
 0x1d8   : > { %v1752_v41 = vpop.permute.xlu0 %1751 }
 0x1d9   : > { %v1174_v22 = vpop.permute.xlu1 %1173  ;;  %v1864_v50 = vld [vmem:[#allocation2 + $0x70] sm:$0xff]  ;;  %1833 = vst.msk [vmem:[#allocation2 + $0x78] sm:$0xff] %vm1817_vm9, %v1752_v41 }
 0x1da   : > { %1253 = vst.msk [vmem:[#allocation2 + $0x88] sm:$0xff] %vm1235_vm6, %v1174_v22  ;;  %2721 = vmatprep.mubr.f32.mxu0 %v1864_v50  ;;  %1000 = vrot.lane.b32.xlu0 %v2573_v0, %s2983_s9 }
 0x1db   : > { %1191 = vrot.lane.b32.xlu1 %v2604_v34, %s2984_s21 }
 0x1dc   : > { %v1368_v3 = vpop.permute.xlu0 %1367 }
 0x1dd   : > { %v790_v23 = vpop.permute.xlu1 %789  ;;  %1448 = vst.msk [vmem:[#allocation2 + $0x80] sm:$0xff] %vm1431_vm7, %v1368_v3 }
 0x1de   : > { %868 = vst.msk [vmem:[#allocation2 + $0x90] sm:$0xff] %vm849_vm4, %v790_v23  ;;  %1771 = vrot.lane.b32.xlu0 %v2605_v30, %s2987_s27 }
 0x1df   : > { %1193 = vrot.lane.b32.xlu1 %v2605_v30, %s2984_s21 }
 0x1e0   : > { %v1370_v42 = vpop.permute.xlu0 %1369  ;;  %v1865_v35 = vld [vmem:[#allocation2 + $0x78] sm:$0xff] }
 0x1e1   : > { %v1561_v24 = vpop.permute.xlu1 %1560  ;;  %1449 = vst.msk [vmem:[#allocation2 + $0x88] sm:$0xff] %vm1431_vm7, %v1370_v42  ;;  %2722 = vmatmul.mubr.f32.gmra.mrb[14].mxu0 %v1865_v35 }
 0x1e2   : > { %1641 = vst.msk [vmem:[#allocation2 + $0x80] sm:$0xff] %vm1624_vm8, %v1561_v24  ;;  %1387 = vrot.lane.b32.xlu0 %v2542_v51, %s2985_s29 }
 0x1e3   : > { %809 = vrot.lane.b32.xlu1 %v2542_v51, %s2982_s6 }
 0x1e4   : > { %v792_v53 = vpop.permute.xlu0 %791 }
 0x1e5   : > { %v983_v2 = vpop.permute.xlu1 %982  ;;  %869 = vst.msk [vmem:[#allocation2 + $0x98] sm:$0xff] %vm849_vm4, %v792_v53 }
 0x1e6   : > { %1061 = vst.msk [vmem:[#allocation2 + $0x90] sm:$0xff] %vm1042_vm5, %v983_v2  ;;  %1389 = vrot.lane.b32.xlu0 %v2543_v7, %s2985_s29 }
 0x1e7   : > { %1580 = vrot.lane.b32.xlu1 %v2574_v52, %s2986_s11 }
 0x1e8   : > { %v1563_v8 = vpop.permute.xlu0 %1562 }
 0x1e9   : > { %v1754_v31 = vpop.permute.xlu1 %1753  ;;  %1642 = vst.msk [vmem:[#allocation2 + $0x88] sm:$0xff] %vm1624_vm8, %v1563_v8 }
 0x1ea   : > { %1834 = vst.msk [vmem:[#allocation2 + $0x80] sm:$0xff] %vm1817_vm9, %v1754_v31  ;;  %811 = vrot.lane.b32.xlu0 %v2543_v7, %s2982_s6 }
 0x1eb   : > { %1002 = vrot.lane.b32.xlu1 %v2574_v52, %s2983_s9 }
 0x1ec   : > { %v985_v4 = vpop.permute.xlu0 %984 }
 0x1ed   : > { %v1176_v25 = vpop.permute.xlu1 %1175  ;;  %1062 = vst.msk [vmem:[#allocation2 + $0x98] sm:$0xff] %vm1042_vm5, %v985_v4 }
 0x1ee   : > { %1254 = vst.msk [vmem:[#allocation2 + $0x90] sm:$0xff] %vm1235_vm6, %v1176_v25  ;;  %1582 = vrot.lane.b32.xlu0 %v2575_v36, %s2986_s11 }
 0x1ef   : > { %1773 = vrot.lane.b32.xlu1 %v2606_v43, %s2987_s27 }
 0x1f0   : > { %v1756_v26 = vpop.permute.xlu0 %1755 }
 0x1f1   : > { %v1178_v9 = vpop.permute.xlu1 %1177  ;;  %v1866_v54 = vld [vmem:[#allocation2 + $0x80] sm:$0xff]  ;;  %1835 = vst.msk [vmem:[#allocation2 + $0x88] sm:$0xff] %vm1817_vm9, %v1756_v26 }
 0x1f2   : > { %1255 = vst.msk [vmem:[#allocation2 + $0x98] sm:$0xff] %vm1235_vm6, %v1178_v9  ;;  %2724 = vmatprep.mubr.f32.mxu1 %v1866_v54  ;;  %1004 = vrot.lane.b32.xlu0 %v2575_v36, %s2983_s9 }
 0x1f3   : > { %1195 = vrot.lane.b32.xlu1 %v2606_v43, %s2984_s21 }
 0x1f4   : > { %v1372_v56 = vpop.permute.xlu0 %1371 }
 0x1f5   : > { %v794_v10 = vpop.permute.xlu1 %793  ;;  %1450 = vst.msk [vmem:[#allocation2 + $0x90] sm:$0xff] %vm1431_vm7, %v1372_v56 }
 0x1f6   : > { %870 = vst.msk [vmem:[#allocation2 + $0xa0] sm:$0xff] %vm849_vm4, %v794_v10  ;;  %1775 = vrot.lane.b32.xlu0 %v2607_v55, %s2987_s27 }
 0x1f7   : > { %1197 = vrot.lane.b32.xlu1 %v2607_v55, %s2984_s21 }
 0x1f8   : > { %v1374_v45 = vpop.permute.xlu0 %1373  ;;  %v1867_v13 = vld [vmem:[#allocation2 + $0x88] sm:$0xff] }
 0x1f9   : > { %v1565_v37 = vpop.permute.xlu1 %1564  ;;  %1451 = vst.msk [vmem:[#allocation2 + $0x98] sm:$0xff] %vm1431_vm7, %v1374_v45  ;;  %2725 = vmatmul.mubr.f32.vlgmr.msra.gmra.mrb[0].mxu1 %v1867_v13 }
 0x1fa   : > { %1643 = vst.msk [vmem:[#allocation2 + $0x90] sm:$0xff] %vm1624_vm8, %v1565_v37  ;;  %1391 = vrot.lane.b32.xlu0 %v2544_v44, %s2985_s29 }
 0x1fb   : > { %813 = vrot.lane.b32.xlu1 %v2544_v44, %s2982_s6 }
 0x1fc   : > { %v796_v11 = vpop.permute.xlu0 %795 }
 0x1fd   : > { %v987_v17 = vpop.permute.xlu1 %986  ;;  %871 = vst.msk [vmem:[#allocation2 + $0xa8] sm:$0xff] %vm849_vm4, %v796_v11 }
 0x1fe   : > { %1063 = vst.msk [vmem:[#allocation2 + $0xa0] sm:$0xff] %vm1042_vm5, %v987_v17  ;;  %1393 = vrot.lane.b32.xlu0 %v2545_v27, %s2985_s29 }
 0x1ff   : > { %1584 = vrot.lane.b32.xlu1 %v2576_v28, %s2986_s11 }
 0x200   : > { %v1567_v38 = vpop.permute.xlu0 %1566 }
 0x201   : > { %v1758_v57 = vpop.permute.xlu1 %1757  ;;  %1644 = vst.msk [vmem:[#allocation2 + $0x98] sm:$0xff] %vm1624_vm8, %v1567_v38 }
 0x202   : > { %1836 = vst.msk [vmem:[#allocation2 + $0x90] sm:$0xff] %vm1817_vm9, %v1758_v57  ;;  %815 = vrot.lane.b32.xlu0 %v2545_v27, %s2982_s6  ;;  %s4014_s6 = sand.u32 1, %s2961_s13  }
 0x203   : > { %1006 = vrot.lane.b32.xlu1 %v2576_v28, %s2983_s9  ;;  %s2265_s8 = scalar_lea.sflag [#allocation4], %s4014_s6 }
 0x204   : > { %v989_v46 = vpop.permute.xlu0 %988 }
 0x205   : > { %v1180_v47 = vpop.permute.xlu1 %1179  ;;  %1064 = vst.msk [vmem:[#allocation2 + $0xa8] sm:$0xff] %vm1042_vm5, %v989_v46 }
 0x206   : > { %1256 = vst.msk [vmem:[#allocation2 + $0xa0] sm:$0xff] %vm1235_vm6, %v1180_v47  ;;  %1586 = vrot.lane.b32.xlu0 %v2577_v58, %s2986_s11 }
 0x207   : > { %1777 = vrot.lane.b32.xlu1 %v2608_v12, %s2987_s27 }
 0x208   : > { %v1760_v59 = vpop.permute.xlu0 %1759 }
 0x209   : > { %v1182_v29 = vpop.permute.xlu1 %1181  ;;  %v1868_v20 = vld [vmem:[#allocation2 + $0x90] sm:$0xff]  ;;  %1837 = vst.msk [vmem:[#allocation2 + $0x98] sm:$0xff] %vm1817_vm9, %v1760_v59 }
 0x20a   : > { %1257 = vst.msk [vmem:[#allocation2 + $0xa8] sm:$0xff] %vm1235_vm6, %v1182_v29  ;;  %2727 = vmatprep.mubr.f32.mxu1 %v1868_v20  ;;  %1008 = vrot.lane.b32.xlu0 %v2577_v58, %s2983_s9  ;;  %s2417_s9 = sshll.u32 %s4014_s6, 8 }
 0x20b   : > { %1199 = vrot.lane.b32.xlu1 %v2608_v12, %s2984_s21 }
 0x20c   : > { %v1376_v60 = vpop.permute.xlu0 %1375 }
 0x20d   : > { %v798_v15 = vpop.permute.xlu1 %797  ;;  %1452 = vst.msk [vmem:[#allocation2 + $0xa0] sm:$0xff] %vm1431_vm7, %v1376_v60 }
 0x20e   : > { %872 = vst.msk [vmem:[#allocation2 + $0xb0] sm:$0xff] %vm849_vm4, %v798_v15  ;;  %1779 = vrot.lane.b32.xlu0 %v2609_v21, %s2987_s27 }
 0x20f   : > { %1201 = vrot.lane.b32.xlu1 %v2609_v21, %s2984_s21  ;;  %s4030_s21 = scalar_lea.vmem [#allocation3], %s2417_s9 }
 0x210   : > { %v1378_v61 = vpop.permute.xlu0 %1377  ;;  %v1869_v16 = vld [vmem:[#allocation2 + $0x98] sm:$0xff]  ;;  %s2284_s28 = sshll.u32 %s4030_s21, 4  ;;  %s4130_s28 = int_to_ptr.vmem [resolvable:$true] %s2284_s28 }
 0x211   : > { %v1569_v62 = vpop.permute.xlu1 %1568  ;;  %1453 = vst.msk [vmem:[#allocation2 + $0xa8] sm:$0xff] %vm1431_vm7, %v1378_v61  ;;  %2728 = vmatmul.mubr.f32.gmra.mrb[2].mxu1 %v1869_v16  ;;  %s2867_s10 = scalar_lea.vmem %s4130_s28, 4096 }
 0x212   : > { %1645 = vst.msk [vmem:[#allocation2 + $0xa0] sm:$0xff] %vm1624_vm8, %v1569_v62  ;;  %1395 = vrot.lane.b32.xlu0 %v2546_v39, %s2985_s29  ;;  %p2868_p12 = scmp.ne.s32.totalorder %s4130_s28, %s2867_s10 }
 0x213   : > { %1397 = vrot.lane.b32.xlu1 %v2547_v32, %s2985_s29 }
 0x214   : > { %v800_v40 = vpop.permute.xlu0 %799  ;;  %p2869_p13 = pnand %p2868_p12, %p3051_p4 }
 0x215   : > { %v991_v5 = vpop.permute.xlu1 %990  ;;  %873 = vst.msk [vmem:[#allocation2 + $0xb8] sm:$0xff] %vm849_vm4, %v800_v40 }
 0x216   : > { %1065 = vst.msk [vmem:[#allocation2 + $0xb0] sm:$0xff] %vm1042_vm5, %v991_v5  ;;  %1588 = vrot.lane.b32.xlu0 %v2578_v48, %s2986_s11  ;;  %p2870_p0 = pneg %p2869_p13 }
 0x217   : > { %1590 = vrot.lane.b32.xlu1 %v2579_v49, %s2986_s11  ;;  %s2988_s11 = smov [#allocation3]  }
 0x218   : > { %v1571_v14 = vpop.permute.xlu0 %1570  ;;  %v2702_v18 = vpop.f32.mrb[0].mxu0  ;;  %s2871_s18 = sshll.u32 %s2988_s11, 4  ;;  %s2872_s18 = int_to_ptr.vmem [resolvable:$false] %s2871_s18 }
 0x219   : > { %1646 = vst.msk [vmem:[#allocation2 + $0xa8] sm:$0xff] %vm1624_vm8, %v1571_v14  ;;  %2124 = vst [vmem:[%s4030_s21 + $0x8] sm:$0xff] %v2702_v18  ;;  %v2193_v19 = vmul.f32 %v2702_v18, %v2702_v18  ;;  %v1762_v0 = vpop.permute.xlu1 %1761  ;;  %v1964_v34 = vpop.f32.mrb[1].mxu0  ;;  %s2873_s19 = scalar_lea.vmem %s2872_s18, 8192  ;;  %p2874_p1 = scmp.lt.s32.totalorder %s4130_s28, %s2872_s18 }
 0x21a   : > { %1838 = vst.msk [vmem:[#allocation2 + $0xa0] sm:$0xff] %vm1817_vm9, %v1762_v0  ;;  %2123 = vst [vmem:[%s4030_s21] sm:$0xff] %v1964_v34  ;;  %v2155_v1 = vadd.f32 %v2702_v18, %v1964_v34  ;;  %v2192_v6 = vmul.f32 %v1964_v34, %v1964_v34  ;;  %1781 = vrot.lane.b32.xlu0 %v2610_v63, %s2987_s27  ;;  %p2875_p2 = scmp.lt.s32.totalorder %s2873_s19, %s2867_s10 }
 0x21b   : > { %1783 = vrot.lane.b32.xlu1 %v2611_v33, %s2987_s27 }
 0x21c   : > { %v2224_v41 = vadd.f32 %v2193_v19, %v2192_v6  ;;  %v993_v22 = vpop.permute.xlu0 %992  ;;  %p2876_p3 = por %p2875_p2, %p2874_p1 }
 0x21d   : > { %1066 = vst.msk [vmem:[#allocation2 + $0xb8] sm:$0xff] %vm1042_vm5, %v993_v22  ;;  %v1184_v50 = vpop.permute.xlu1 %1183 }
 0x21e   : > { %1258 = vst.msk [vmem:[#allocation2 + $0xb0] sm:$0xff] %vm1235_vm6, %v1184_v50  ;;  %p2877_p5 = pnand %p2876_p3, %p2870_p0 }
 0x220   : > { %v1764_v30 = vpop.permute.xlu0 %1763 }
 0x221   : > { %1839 = vst.msk [vmem:[#allocation2 + $0xa8] sm:$0xff] %vm1817_vm9, %v1764_v30  ;;  %v1186_v3 = vpop.permute.xlu1 %1185  ;;  %v1870_v23 = vld [vmem:[#allocation2 + $0xa0] sm:$0xff] }
 0x222   : > { %1259 = vst.msk [vmem:[#allocation2 + $0xb8] sm:$0xff] %vm1235_vm6, %v1186_v3  ;;  %2730 = vmatprep.mubr.f32.mxu1 %v1870_v23 }
 0x224   : > { %v1380_v51 = vpop.permute.xlu0 %1379 }
 0x225   : > { %1454 = vst.msk [vmem:[#allocation2 + $0xb0] sm:$0xff] %vm1431_vm7, %v1380_v51  ;;  %v802_v42 = vpop.permute.xlu1 %801 }
 0x226   : > { %874 = vst.msk [vmem:[#allocation2 + $0xc0] sm:$0xff] %vm849_vm4, %v802_v42 }
 0x228   : > { %v1382_v24 = vpop.permute.xlu0 %1381  ;;  %v1871_v35 = vld [vmem:[#allocation2 + $0xa8] sm:$0xff] }
 0x229   : > { %1455 = vst.msk [vmem:[#allocation2 + $0xb8] sm:$0xff] %vm1431_vm7, %v1382_v24  ;;  %v1573_v7 = vpop.permute.xlu1 %1572  ;;  %2731 = vmatmul.mubr.f32.gmra.mrb[4].mxu1 %v1871_v35 }
 0x22a   : > { %1647 = vst.msk [vmem:[#allocation2 + $0xb0] sm:$0xff] %vm1624_vm8, %v1573_v7 }
 0x22c   : > { %v804_v52 = vpop.permute.xlu0 %803  ;;  %v2705_v53 = vpop.f32.mrb[2].mxu0 }
 0x22d   : > { %875 = vst.msk [vmem:[#allocation2 + $0xc8] sm:$0xff] %vm849_vm4, %v804_v52  ;;  %2126 = vst [vmem:[%s4030_s21 + $0x18] sm:$0xff] %v2705_v53  ;;  %v995_v2 = vpop.permute.xlu1 %994  ;;  %v1974_v8 = vpop.f32.mrb[3].mxu0  ;;  %v2195_v43 = vmul.f32 %v2705_v53, %v2705_v53 }
 0x22e   : > { %1067 = vst.msk [vmem:[#allocation2 + $0xc0] sm:$0xff] %vm1042_vm5, %v995_v2  ;;  %2125 = vst [vmem:[%s4030_s21 + $0x10] sm:$0xff] %v1974_v8  ;;  %v2156_v31 = vadd.f32 %v2155_v1, %v1974_v8  ;;  %v2194_v36 = vmul.f32 %v1974_v8, %v1974_v8 }
 0x230   : > { %v2225_v4 = vadd.f32 %v2224_v41, %v2194_v36  ;;  %v1575_v25 = vpop.permute.xlu0 %1574  ;;  %v2157_v26 = vadd.f32 %v2705_v53, %v2156_v31 }
 0x231   : > { %1648 = vst.msk [vmem:[#allocation2 + $0xb8] sm:$0xff] %vm1624_vm8, %v1575_v25  ;;  %v1766_v9 = vpop.permute.xlu1 %1765 }
 0x232   : > { %1840 = vst.msk [vmem:[#allocation2 + $0xb0] sm:$0xff] %vm1817_vm9, %v1766_v9  ;;  %v2226_v54 = vadd.f32 %v2225_v4, %v2195_v43 }
 0x234   : > { %v997_v55 = vpop.permute.xlu0 %996 }
 0x235   : > { %1068 = vst.msk [vmem:[#allocation2 + $0xc8] sm:$0xff] %vm1042_vm5, %v997_v55  ;;  %v1188_v56 = vpop.permute.xlu1 %1187 }
 0x236   : > { %1260 = vst.msk [vmem:[#allocation2 + $0xc0] sm:$0xff] %vm1235_vm6, %v1188_v56 }
 0x238   : > { %v1768_v10 = vpop.permute.xlu0 %1767 }
 0x239   : > { %1841 = vst.msk [vmem:[#allocation2 + $0xb8] sm:$0xff] %vm1817_vm9, %v1768_v10  ;;  %v1190_v44 = vpop.permute.xlu1 %1189  ;;  %v1872_v45 = vld [vmem:[#allocation2 + $0xb0] sm:$0xff] }
 0x23a   : > { %1261 = vst.msk [vmem:[#allocation2 + $0xc8] sm:$0xff] %vm1235_vm6, %v1190_v44  ;;  %2733 = vmatprep.mubr.f32.mxu1 %v1872_v45 }
 0x23c   : > { %v1384_v37 = vpop.permute.xlu0 %1383 }
 0x23d   : > { %1456 = vst.msk [vmem:[#allocation2 + $0xc0] sm:$0xff] %vm1431_vm7, %v1384_v37  ;;  %v806_v13 = vpop.permute.xlu1 %805 }
 0x23e   : > { %876 = vst.msk [vmem:[#allocation2 + $0xd0] sm:$0xff] %vm849_vm4, %v806_v13 }
 0x240   : > { %v1386_v27 = vpop.permute.xlu0 %1385  ;;  %v2708_v28 = vpop.f32.mrb[4].mxu0  ;;  %v1873_v11 = vld [vmem:[#allocation2 + $0xb8] sm:$0xff] }
 0x241   : > { %1457 = vst.msk [vmem:[#allocation2 + $0xc8] sm:$0xff] %vm1431_vm7, %v1386_v27  ;;  %2128 = vst [vmem:[%s4030_s21 + $0x28] sm:$0xff] %v2708_v28  ;;  %v1577_v17 = vpop.permute.xlu1 %1576  ;;  %v1984_v38 = vpop.f32.mrb[5].mxu0  ;;  %2734 = vmatmul.mubr.f32.gmra.mrb[6].mxu1 %v1873_v11  ;;  %v2197_v12 = vmul.f32 %v2708_v28, %v2708_v28 }
 0x242   : > { %1649 = vst.msk [vmem:[#allocation2 + $0xc0] sm:$0xff] %vm1624_vm8, %v1577_v17  ;;  %2127 = vst [vmem:[%s4030_s21 + $0x20] sm:$0xff] %v1984_v38  ;;  %v2158_v57 = vadd.f32 %v2157_v26, %v1984_v38  ;;  %v2196_v58 = vmul.f32 %v1984_v38, %v1984_v38 }
 0x244   : > { %v2227_v46 = vadd.f32 %v2226_v54, %v2196_v58  ;;  %v808_v47 = vpop.permute.xlu0 %807  ;;  %v2159_v59 = vadd.f32 %v2708_v28, %v2158_v57 }
 0x245   : > { %877 = vst.msk [vmem:[#allocation2 + $0xd8] sm:$0xff] %vm849_vm4, %v808_v47  ;;  %v999_v29 = vpop.permute.xlu1 %998 }
 0x246   : > { %1069 = vst.msk [vmem:[#allocation2 + $0xd0] sm:$0xff] %vm1042_vm5, %v999_v29  ;;  %v2228_v20 = vadd.f32 %v2227_v46, %v2197_v12 }
 0x248   : > { %v1579_v21 = vpop.permute.xlu0 %1578 }
 0x249   : > { %1650 = vst.msk [vmem:[#allocation2 + $0xc8] sm:$0xff] %vm1624_vm8, %v1579_v21  ;;  %v1770_v60 = vpop.permute.xlu1 %1769 }
 0x24a   : > { %1842 = vst.msk [vmem:[#allocation2 + $0xc0] sm:$0xff] %vm1817_vm9, %v1770_v60 }
 0x24c   : > { %v1001_v15 = vpop.permute.xlu0 %1000 }
 0x24d   : > { %1070 = vst.msk [vmem:[#allocation2 + $0xd8] sm:$0xff] %vm1042_vm5, %v1001_v15  ;;  %v1192_v39 = vpop.permute.xlu1 %1191 }
 0x24e   : > { %1262 = vst.msk [vmem:[#allocation2 + $0xd0] sm:$0xff] %vm1235_vm6, %v1192_v39 }
 0x250   : > { %v1772_v32 = vpop.permute.xlu0 %1771 }
 0x251   : > { %1843 = vst.msk [vmem:[#allocation2 + $0xc8] sm:$0xff] %vm1817_vm9, %v1772_v32  ;;  %v1194_v61 = vpop.permute.xlu1 %1193  ;;  %v1874_v62 = vld [vmem:[#allocation2 + $0xc0] sm:$0xff] }
 0x252   : > { %1263 = vst.msk [vmem:[#allocation2 + $0xd8] sm:$0xff] %vm1235_vm6, %v1194_v61  ;;  %2736 = vmatprep.mubr.f32.mxu1 %v1874_v62 }
 0x254   : > { %v1388_v16 = vpop.permute.xlu0 %1387  ;;  %v2711_v48 = vpop.f32.mrb[6].mxu0 }
 0x255   : > { %1458 = vst.msk [vmem:[#allocation2 + $0xd0] sm:$0xff] %vm1431_vm7, %v1388_v16  ;;  %2130 = vst [vmem:[%s4030_s21 + $0x38] sm:$0xff] %v2711_v48  ;;  %v810_v49 = vpop.permute.xlu1 %809  ;;  %v1994_v40 = vpop.f32.mrb[7].mxu0  ;;  %v2199_v33 = vmul.f32 %v2711_v48, %v2711_v48 }
 0x256   : > { %878 = vst.msk [vmem:[#allocation2 + $0xe0] sm:$0xff] %vm849_vm4, %v810_v49  ;;  %2129 = vst [vmem:[%s4030_s21 + $0x30] sm:$0xff] %v1994_v40  ;;  %v2160_v5 = vadd.f32 %v2159_v59, %v1994_v40  ;;  %v2198_v63 = vmul.f32 %v1994_v40, %v1994_v40 }
 0x258   : > { %v2229_v14 = vadd.f32 %v2228_v20, %v2198_v63  ;;  %v1390_v18 = vpop.permute.xlu0 %1389  ;;  %v1875_v19 = vld [vmem:[#allocation2 + $0xc8] sm:$0xff]  ;;  %v2161_v0 = vadd.f32 %v2711_v48, %v2160_v5 }
 0x259   : > { %1459 = vst.msk [vmem:[#allocation2 + $0xd8] sm:$0xff] %vm1431_vm7, %v1390_v18  ;;  %v1581_v34 = vpop.permute.xlu1 %1580  ;;  %2737 = vmatmul.mubr.f32.gmra.mrb[8].mxu1 %v1875_v19 }
 0x25a   : > { %1651 = vst.msk [vmem:[#allocation2 + $0xd0] sm:$0xff] %vm1624_vm8, %v1581_v34  ;;  %v2230_v1 = vadd.f32 %v2229_v14, %v2199_v33 }
 0x25c   : > { %v812_v6 = vpop.permute.xlu0 %811 }
 0x25d   : > { %879 = vst.msk [vmem:[#allocation2 + $0xe8] sm:$0xff] %vm849_vm4, %v812_v6  ;;  %v1003_v41 = vpop.permute.xlu1 %1002 }
 0x25e   : > { %1071 = vst.msk [vmem:[#allocation2 + $0xe0] sm:$0xff] %vm1042_vm5, %v1003_v41 }
 0x260   : > { %v1583_v22 = vpop.permute.xlu0 %1582 }
 0x261   : > { %1652 = vst.msk [vmem:[#allocation2 + $0xd8] sm:$0xff] %vm1624_vm8, %v1583_v22  ;;  %v1774_v50 = vpop.permute.xlu1 %1773 }
 0x262   : > { %1844 = vst.msk [vmem:[#allocation2 + $0xd0] sm:$0xff] %vm1817_vm9, %v1774_v50 }
 0x264   : > { %v1005_v30 = vpop.permute.xlu0 %1004 }
 0x265   : > { %1072 = vst.msk [vmem:[#allocation2 + $0xe8] sm:$0xff] %vm1042_vm5, %v1005_v30  ;;  %v1196_v3 = vpop.permute.xlu1 %1195 }
 0x266   : > { %1264 = vst.msk [vmem:[#allocation2 + $0xe0] sm:$0xff] %vm1235_vm6, %v1196_v3 }
 0x268   : > { %v1776_v23 = vpop.permute.xlu0 %1775 }
 0x269   : > { %1845 = vst.msk [vmem:[#allocation2 + $0xd8] sm:$0xff] %vm1817_vm9, %v1776_v23  ;;  %v1198_v51 = vpop.permute.xlu1 %1197  ;;  %v1876_v42 = vld [vmem:[#allocation2 + $0xd0] sm:$0xff] }
 0x26a   : > { %1265 = vst.msk [vmem:[#allocation2 + $0xe8] sm:$0xff] %vm1235_vm6, %v1198_v51  ;;  %2739 = vmatprep.mubr.f32.mxu1 %v1876_v42 }
 0x26c   : > { %v1392_v24 = vpop.permute.xlu0 %1391  ;;  %v2714_v35 = vpop.f32.mrb[8].mxu0 }
 0x26d   : > { %1460 = vst.msk [vmem:[#allocation2 + $0xe0] sm:$0xff] %vm1431_vm7, %v1392_v24  ;;  %2132 = vst [vmem:[%s4030_s21 + $0x48] sm:$0xff] %v2714_v35  ;;  %v814_v7 = vpop.permute.xlu1 %813  ;;  %v2004_v52 = vpop.f32.mrb[9].mxu0  ;;  %v2201_v8 = vmul.f32 %v2714_v35, %v2714_v35 }
 0x26e   : > { %880 = vst.msk [vmem:[#allocation2 + $0xf0] sm:$0xff] %vm849_vm4, %v814_v7  ;;  %2131 = vst [vmem:[%s4030_s21 + $0x40] sm:$0xff] %v2004_v52  ;;  %v2162_v53 = vadd.f32 %v2161_v0, %v2004_v52  ;;  %v2200_v2 = vmul.f32 %v2004_v52, %v2004_v52 }
 0x270   : > { %v2231_v31 = vadd.f32 %v2230_v1, %v2200_v2  ;;  %v1394_v36 = vpop.permute.xlu0 %1393  ;;  %v1877_v43 = vld [vmem:[#allocation2 + $0xd8] sm:$0xff]  ;;  %v2163_v4 = vadd.f32 %v2714_v35, %v2162_v53 }
 0x271   : > { %1461 = vst.msk [vmem:[#allocation2 + $0xe8] sm:$0xff] %vm1431_vm7, %v1394_v36  ;;  %v1585_v25 = vpop.permute.xlu1 %1584  ;;  %2740 = vmatmul.mubr.f32.gmra.mrb[10].mxu1 %v1877_v43 }
 0x272   : > { %1653 = vst.msk [vmem:[#allocation2 + $0xe0] sm:$0xff] %vm1624_vm8, %v1585_v25  ;;  %v2232_v26 = vadd.f32 %v2231_v31, %v2201_v8 }
 0x274   : > { %v816_v9 = vpop.permute.xlu0 %815 }
 0x275   : > { %881 = vst.msk [vmem:[#allocation2 + $0xf8] sm:$0xff] %vm849_vm4, %v816_v9  ;;  %v1007_v54 = vpop.permute.xlu1 %1006 }
 0x276   : > { %1073 = vst.msk [vmem:[#allocation2 + $0xf0] sm:$0xff] %vm1042_vm5, %v1007_v54 }
 0x278   : > { %v1587_v55 = vpop.permute.xlu0 %1586 }
 0x279   : > { %1654 = vst.msk [vmem:[#allocation2 + $0xe8] sm:$0xff] %vm1624_vm8, %v1587_v55  ;;  %v1778_v56 = vpop.permute.xlu1 %1777 }
 0x27a   : > { %1846 = vst.msk [vmem:[#allocation2 + $0xe0] sm:$0xff] %vm1817_vm9, %v1778_v56 }
 0x27c   : > { %v1009_v10 = vpop.permute.xlu0 %1008 }
 0x27d   : > { %1074 = vst.msk [vmem:[#allocation2 + $0xf8] sm:$0xff] %vm1042_vm5, %v1009_v10  ;;  %v1200_v44 = vpop.permute.xlu1 %1199 }
 0x27e   : > { %1266 = vst.msk [vmem:[#allocation2 + $0xf0] sm:$0xff] %vm1235_vm6, %v1200_v44 }
 0x280   : > { %v1780_v45 = vpop.permute.xlu0 %1779 }
 0x281   : > { %1847 = vst.msk [vmem:[#allocation2 + $0xe8] sm:$0xff] %vm1817_vm9, %v1780_v45  ;;  %v1202_v37 = vpop.permute.xlu1 %1201  ;;  %v1878_v13 = vld [vmem:[#allocation2 + $0xe0] sm:$0xff] }
 0x282   : > { %1267 = vst.msk [vmem:[#allocation2 + $0xf8] sm:$0xff] %vm1235_vm6, %v1202_v37  ;;  %2742 = vmatprep.mubr.f32.mxu1 %v1878_v13 }
 0x284   : > { %v1396_v27 = vpop.permute.xlu0 %1395  ;;  %v2717_v28 = vpop.f32.mrb[10].mxu0 }
 0x285   : > { %1462 = vst.msk [vmem:[#allocation2 + $0xf0] sm:$0xff] %vm1431_vm7, %v1396_v27  ;;  %2134 = vst [vmem:[%s4030_s21 + $0x58] sm:$0xff] %v2717_v28  ;;  %v1398_v11 = vpop.permute.xlu1 %1397  ;;  %v2014_v17 = vpop.f32.mrb[11].mxu0  ;;  %v2203_v58 = vmul.f32 %v2717_v28, %v2717_v28 }
 0x286   : > { %1463 = vst.msk [vmem:[#allocation2 + $0xf8] sm:$0xff] %vm1431_vm7, %v1398_v11  ;;  %2133 = vst [vmem:[%s4030_s21 + $0x50] sm:$0xff] %v2014_v17  ;;  %v2164_v38 = vadd.f32 %v2163_v4, %v2014_v17  ;;  %v2202_v57 = vmul.f32 %v2014_v17, %v2014_v17 }
 0x288   : > { %v2233_v12 = vadd.f32 %v2232_v26, %v2202_v57  ;;  %v1589_v46 = vpop.permute.xlu0 %1588  ;;  %v1879_v47 = vld [vmem:[#allocation2 + $0xe8] sm:$0xff]  ;;  %v2165_v59 = vadd.f32 %v2717_v28, %v2164_v38 }
 0x289   : > { %1655 = vst.msk [vmem:[#allocation2 + $0xf0] sm:$0xff] %vm1624_vm8, %v1589_v46  ;;  %v1591_v29 = vpop.permute.xlu1 %1590  ;;  %2743 = vmatmul.mubr.f32.gmra.mrb[12].mxu1 %v1879_v47 }
 0x28a   : > { %1656 = vst.msk [vmem:[#allocation2 + $0xf8] sm:$0xff] %vm1624_vm8, %v1591_v29  ;;  %v2234_v20 = vadd.f32 %v2233_v12, %v2203_v58 }
 0x28c   : > { %v1782_v21 = vpop.permute.xlu0 %1781 }
 0x28d   : > { %1848 = vst.msk [vmem:[#allocation2 + $0xf0] sm:$0xff] %vm1817_vm9, %v1782_v21  ;;  %v1784_v60 = vpop.permute.xlu1 %1783 }
 0x28e   : > { %1849 = vst.msk [vmem:[#allocation2 + $0xf8] sm:$0xff] %vm1817_vm9, %v1784_v60 }
 0x294   : > { %v1880_v15 = vld [vmem:[#allocation2 + $0xf0] sm:$0xff] }
 0x295   : > { %2745 = vmatprep.mubr.f32.mxu1 %v1880_v15  ;;  %v1881_v39 = vld [vmem:[#allocation2 + $0xf8] sm:$0xff] }
 0x296   : > { %2746 = vmatmul.mubr.f32.gmra.mrb[14].mxu1 %v1881_v39 }
 0x29c   : > { %v2720_v32 = vpop.f32.mrb[12].mxu0 }
 0x29d   : > { %2136 = vst [vmem:[%s4030_s21 + $0x68] sm:$0xff] %v2720_v32  ;;  %v2024_v61 = vpop.f32.mrb[13].mxu0  ;;  %v2205_v48 = vmul.f32 %v2720_v32, %v2720_v32 }
 0x29e   : > { %2135 = vst [vmem:[%s4030_s21 + $0x60] sm:$0xff] %v2024_v61  ;;  %v2166_v62 = vadd.f32 %v2165_v59, %v2024_v61  ;;  %v2204_v16 = vmul.f32 %v2024_v61, %v2024_v61 }
 0x2a0   : > { %v2235_v49 = vadd.f32 %v2234_v20, %v2204_v16  ;;  %v2167_v40 = vadd.f32 %v2720_v32, %v2166_v62 }
 0x2a2   : > { %v2236_v5 = vadd.f32 %v2235_v49, %v2205_v48 }
 0x2b4   : > { %v2723_v63 = vpop.f32.mrb[14].mxu0 }
 0x2b5   : > { %2138 = vst [vmem:[%s4030_s21 + $0x78] sm:$0xff] %v2723_v63  ;;  %v2034_v33 = vpop.f32.mrb[15].mxu0  ;;  %v2207_v19 = vmul.f32 %v2723_v63, %v2723_v63 }
 0x2b6   : > { %2137 = vst [vmem:[%s4030_s21 + $0x70] sm:$0xff] %v2034_v33  ;;  %v2168_v14 = vadd.f32 %v2167_v40, %v2034_v33  ;;  %v2206_v18 = vmul.f32 %v2034_v33, %v2034_v33 }
 0x2b8   : > { %v2169_v0 = vadd.f32 %v2723_v63, %v2168_v14  ;;  %v2237_v34 = vadd.f32 %v2236_v5, %v2206_v18 }
 0x2ba   : > { %v2238_v1 = vadd.f32 %v2237_v34, %v2207_v19 }
 0x2cc   : > { %v2726_v6 = vpop.f32.mrb[0].mxu1 }
 0x2cd   : > { %2140 = vst [vmem:[%s4030_s21 + $0x88] sm:$0xff] %v2726_v6  ;;  %v2044_v41 = vpop.f32.mrb[1].mxu1  ;;  %v2209_v30 = vmul.f32 %v2726_v6, %v2726_v6 }
 0x2ce   : > { %2139 = vst [vmem:[%s4030_s21 + $0x80] sm:$0xff] %v2044_v41  ;;  %v2170_v22 = vadd.f32 %v2169_v0, %v2044_v41  ;;  %v2208_v50 = vmul.f32 %v2044_v41, %v2044_v41 }
 0x2d0   : > { %v2239_v3 = vadd.f32 %v2238_v1, %v2208_v50  ;;  %v2171_v23 = vadd.f32 %v2726_v6, %v2170_v22 }
 0x2d2   : > { %v2240_v51 = vadd.f32 %v2239_v3, %v2209_v30 }
 0x2e4   : > { %v2729_v42 = vpop.f32.mrb[2].mxu1 }
 0x2e5   : > { %2142 = vst [vmem:[%s4030_s21 + $0x98] sm:$0xff] %v2729_v42  ;;  %v2054_v24 = vpop.f32.mrb[3].mxu1  ;;  %v2211_v52 = vmul.f32 %v2729_v42, %v2729_v42 }
 0x2e6   : > { %2141 = vst [vmem:[%s4030_s21 + $0x90] sm:$0xff] %v2054_v24  ;;  %v2172_v35 = vadd.f32 %v2171_v23, %v2054_v24  ;;  %v2210_v7 = vmul.f32 %v2054_v24, %v2054_v24 }
 0x2e8   : > { %v2241_v53 = vadd.f32 %v2240_v51, %v2210_v7  ;;  %v2173_v2 = vadd.f32 %v2729_v42, %v2172_v35 }
 0x2ea   : > { %v2242_v8 = vadd.f32 %v2241_v53, %v2211_v52 }
 0x2fc   : > { %v2732_v31 = vpop.f32.mrb[4].mxu1 }
 0x2fd   : > { %2144 = vst [vmem:[%s4030_s21 + $0xa8] sm:$0xff] %v2732_v31  ;;  %v2064_v36 = vpop.f32.mrb[5].mxu1  ;;  %v2213_v25 = vmul.f32 %v2732_v31, %v2732_v31 }
 0x2fe   : > { %2143 = vst [vmem:[%s4030_s21 + $0xa0] sm:$0xff] %v2064_v36  ;;  %v2174_v43 = vadd.f32 %v2173_v2, %v2064_v36  ;;  %v2212_v4 = vmul.f32 %v2064_v36, %v2064_v36 }
 0x300   : > { %v2243_v26 = vadd.f32 %v2242_v8, %v2212_v4  ;;  %v2175_v9 = vadd.f32 %v2732_v31, %v2174_v43 }
 0x302   : > { %v2244_v54 = vadd.f32 %v2243_v26, %v2213_v25 }
 0x314   : > { %v2735_v55 = vpop.f32.mrb[6].mxu1 }
 0x315   : > { %2146 = vst [vmem:[%s4030_s21 + $0xb8] sm:$0xff] %v2735_v55  ;;  %v2074_v56 = vpop.f32.mrb[7].mxu1  ;;  %v2215_v45 = vmul.f32 %v2735_v55, %v2735_v55 }
 0x316   : > { %2145 = vst [vmem:[%s4030_s21 + $0xb0] sm:$0xff] %v2074_v56  ;;  %v2176_v10 = vadd.f32 %v2175_v9, %v2074_v56  ;;  %v2214_v44 = vmul.f32 %v2074_v56, %v2074_v56 }
 0x318   : > { %v2245_v37 = vadd.f32 %v2244_v54, %v2214_v44  ;;  %v2177_v13 = vadd.f32 %v2735_v55, %v2176_v10 }
 0x31a   : > { %v2246_v27 = vadd.f32 %v2245_v37, %v2215_v45 }
 0x32c   : > { %v2738_v28 = vpop.f32.mrb[8].mxu1 }
 0x32d   : > { %2148 = vst [vmem:[%s4030_s21 + $0xc8] sm:$0xff] %v2738_v28  ;;  %v2084_v11 = vpop.f32.mrb[9].mxu1  ;;  %v2217_v57 = vmul.f32 %v2738_v28, %v2738_v28 }
 0x32e   : > { %2147 = vst [vmem:[%s4030_s21 + $0xc0] sm:$0xff] %v2084_v11  ;;  %v2178_v17 = vadd.f32 %v2177_v13, %v2084_v11  ;;  %v2216_v38 = vmul.f32 %v2084_v11, %v2084_v11 }
 0x330   : > { %v2247_v58 = vadd.f32 %v2246_v27, %v2216_v38  ;;  %v2179_v12 = vadd.f32 %v2738_v28, %v2178_v17 }
 0x332   : > { %v2248_v46 = vadd.f32 %v2247_v58, %v2217_v57 }
 0x344   : > { %v2741_v47 = vpop.f32.mrb[10].mxu1 }
 0x345   : > { %2150 = vst [vmem:[%s4030_s21 + $0xd8] sm:$0xff] %v2741_v47  ;;  %v2094_v59 = vpop.f32.mrb[11].mxu1  ;;  %v2219_v21 = vmul.f32 %v2741_v47, %v2741_v47 }
 0x346   : > { %2149 = vst [vmem:[%s4030_s21 + $0xd0] sm:$0xff] %v2094_v59  ;;  %v2180_v29 = vadd.f32 %v2179_v12, %v2094_v59  ;;  %v2218_v20 = vmul.f32 %v2094_v59, %v2094_v59 }
 0x348   : > { %v2249_v60 = vadd.f32 %v2248_v46, %v2218_v20  ;;  %v2181_v15 = vadd.f32 %v2741_v47, %v2180_v29 }
 0x34a   : > { %v2250_v39 = vadd.f32 %v2249_v60, %v2219_v21 }
 0x35c   : > { %v2744_v32 = vpop.f32.mrb[12].mxu1 }
 0x35d   : > { %2152 = vst [vmem:[%s4030_s21 + $0xe8] sm:$0xff] %v2744_v32  ;;  %v2104_v61 = vpop.f32.mrb[13].mxu1  ;;  %v2221_v48 = vmul.f32 %v2744_v32, %v2744_v32 }
 0x35e   : > { %2151 = vst [vmem:[%s4030_s21 + $0xe0] sm:$0xff] %v2104_v61  ;;  %v2182_v62 = vadd.f32 %v2181_v15, %v2104_v61  ;;  %v2220_v16 = vmul.f32 %v2104_v61, %v2104_v61 }
 0x360   : > { %v2251_v49 = vadd.f32 %v2250_v39, %v2220_v16  ;;  %v2183_v40 = vadd.f32 %v2744_v32, %v2182_v62 }
 0x362   : > { %v2252_v5 = vadd.f32 %v2251_v49, %v2221_v48 }
 0x369   : > { %v2747_v63 = vpop.f32.mrb[14].mxu1 }
 0x36a   : > { %2154 = vst [vmem:[%s4030_s21 + $0xf8] sm:$0xff] %v2747_v63  ;;  %v2114_v33 = vpop.f32.mrb[15].mxu1 }
 0x36b   : > { %2153 = vst [vmem:[%s4030_s21 + $0xf0] sm:$0xff] %v2114_v33  ;;  %v2184_v14 = vadd.f32 %v2183_v40, %v2114_v33  ;;  %v2222_v18 = vmul.f32 %v2114_v33, %v2114_v33 }
 0x36c   : > { %2880 = shalt.err (!%p2877_p5)
}
 0x36d   : > { %s2881_s23 = scalar_lea.hbm %s4128_s7, 4096  ;;  %s2885_s9 = scalar_lea.hbm %s4214_s2, 8192 }
 0x36e   : > { %p2882_p6 = scmp.ne.s32.totalorder %s4128_s7, %s2881_s23  ;;  %p2886_p10 = scmp.lt.u32.totalorder %s4128_s7, %s4214_s2 }
 0x36f   : > { %p2887_p11 = scmp.lt.u32.totalorder %s2885_s9, %s2881_s23  ;;  %p2889_p13 = scmp.lt.u32.totalorder %s2881_s23, %s4128_s7 }
 0x370   : > { %p2883_p7 = pnand %p2882_p6, %p3051_p4 }
 0x371   : > { %p2888_p12 = por %p2887_p11, %p2886_p10 }
 0x372   : > { %p2884_p9 = pneg %p2883_p7 }
 0x373   : > { %p2890_p0 = por %p2889_p13, %p2888_p12 }
 0x375   : > { %p2891_p1 = pnand %p2890_p0, %p2884_p9 }
 0x377   : > { %2894 = shalt.err (!%p2891_p1)
}
 0x378   : > { %s2989_s29 = smov 128   ;;  %v2223_v19 = vmul.f32 %v2747_v63, %v2747_v63  ;;  %v2185_v0 = vadd.f32 %v2747_v63, %v2184_v14  ;;  %v2253_v34 = vadd.f32 %v2252_v5, %v2222_v18  ;;  %s2418_s4 = sshll.u32 %s4014_s6, 1  ;;  %vm2261_vm10 = vcmask 1040384  }
 0x379   : > { %2797 = dma.vmem_to_hbm [thread:$0]  (%p3051_p4), %s4130_s28, 4096, %s4128_s7, %s2265_s8, %s2989_s29, %s2989_s29, %s2981_s5  }
 0x37a   : > { %v2186_v1 = vrot.slane %v2185_v0, 4  ;;  %v2254_v6 = vadd.f32 %v2253_v34, %v2223_v19  ;;  %s2616_s10 = sshll.u32 %s2969_s15, 5  ;;  %s190_s5 = scalar_lea.vmem [#allocation5], %s2418_s4 }
 0x37b   : > { %s2301_s28 = sshll.u32 %s190_s5, 4  ;;  %s4164_s11 = scalar_lea.hbm %s4215_s3, %s2616_s10  ;;  %s4166_s28 = int_to_ptr.vmem [resolvable:$true] %s2301_s28 }
 0x37c   : > { %v2187_v41 = vadd.f32 %v2186_v1, %v2185_v0  ;;  %v2255_v22 = vrot.slane %v2254_v6, 4  ;;  %s2270_s18 = scalar_lea.sflag [#allocation6], %s4014_s6  ;;  %s2895_s19 = scalar_lea.vmem %s4166_s28, 32 }
 0x37d   : > { %p2896_p2 = scmp.ne.s32.totalorder %s4166_s28, %s2895_s19  ;;  %s2990_s15 = smov [#allocation5]  }
 0x37e   : > { %v2188_v50 = vrot.slane %v2187_v41, 2  ;;  %v2256_v30 = vadd.f32 %v2255_v22, %v2254_v6  ;;  %s2899_s23 = sshll.u32 %s2990_s15, 4  ;;  %s2900_s23 = int_to_ptr.vmem [resolvable:$false] %s2899_s23 }
 0x37f   : > { %p2897_p3 = pnand %p2896_p2, %p3051_p4  ;;  %s2901_s26 = scalar_lea.vmem %s2900_s23, 64 }
 0x380   : > { %v2189_v3 = vadd.f32 %v2188_v50, %v2187_v41  ;;  %v2257_v23 = vrot.slane %v2256_v30, 2  ;;  %p2902_p6 = scmp.lt.s32.totalorder %s4166_s28, %s2900_s23  ;;  %p2903_p7 = scmp.lt.s32.totalorder %s2901_s26, %s2895_s19 }
 0x381   : > { %p2898_p5 = pneg %p2897_p3 }
 0x382   : > { %v2190_v51 = vrot.slane %v2189_v3, 1  ;;  %v2258_v42 = vadd.f32 %v2257_v23, %v2256_v30  ;;  %p2904_p9 = por %p2903_p7, %p2902_p6 }
 0x384   : > { %v2259_v24 = vrot.slane %v2258_v42, 1  ;;  %v2191_v35 = vadd.f32 %v2190_v51, %v2189_v3  ;;  %p2905_p10 = pnand %p2904_p9, %p2898_p5 }
 0x386   : > { %v2260_v7 = vadd.f32 %v2259_v24, %v2258_v42 }
 0x388   : > { %v2262_v52 = vsel %vm2261_vm10, %v2191_v35, %v2260_v7 }
 0x389   : > { %2263 = vst [vmem:[%s190_s5] sm:$0x3] %v2262_v52 }
 0x38a   : > { %2908 = shalt.err (!%p2905_p10)
}
 0x38b   : > { %s2909_s6 = scalar_lea.hbm %s4164_s11, 32  ;;  %s2913_s21 = scalar_lea.hbm %s4215_s3, 64 }
 0x38c   : > { %p2910_p11 = scmp.ne.s32.totalorder %s4164_s11, %s2909_s6  ;;  %p2914_p0 = scmp.lt.u32.totalorder %s4164_s11, %s4215_s3 }
 0x38d   : > { %p2915_p1 = scmp.lt.u32.totalorder %s2913_s21, %s2909_s6  ;;  %p2917_p3 = scmp.lt.u32.totalorder %s2909_s6, %s4164_s11 }
 0x38e   : > { %p2911_p12 = pnand %p2910_p11, %p3051_p4 }
 0x38f   : > { %p2916_p2 = por %p2915_p1, %p2914_p0 }
 0x390   : > { %p2912_p13 = pneg %p2911_p12 }
 0x391   : > { %p2918_p5 = por %p2917_p3, %p2916_p2 }
 0x393   : > { %p2919_p6 = pnand %p2918_p5, %p2912_p13 }
 0x395   : > { %2922 = shalt.err (!%p2919_p6)
}
 0x396   : > { %2798 = dma.vmem_to_hbm [thread:$0]  (%p3051_p4), %s4166_s28, 32, %s4164_s11, %s2270_s18  }
 0x397 PF: > { %p2808_p7 = scmp.ge.s32.totalorder %s2977_s17, 2  ;;  %s2313_s4 = sand.u32 1, %s2957_s12  }
 0x398   : > { %s2314_s10 = scalar_lea.sflag [#allocation4], %s2313_s4 }
 0x399   : > { %p2802_p9 = pnand %p2808_p7, %p3058_p8 }
 0x39b   : > { %2948 = dma.done.wait (!%p2802_p9), %s2314_s10, 4096  }
 0x39c   : > { %2950 = vsyncadd (!%p2802_p9), %s2314_s10, 4294963200  ;;  %s2323_s5 = scalar_lea.sflag [#allocation6], %s2313_s4 }
 0x39d   : > { %2952 = dma.done.wait (!%p2802_p9), %s2323_s5, 32  }
 0x39e   : > { %2954 = vsyncadd (!%p2802_p9), %s2323_s5, 4294967264  ;;  %s20_s17 = sadd.s32 1, %s2977_s17   ;;  %s4218_s12 = smov %s2961_s13 }
 0x39f   : > { %p17_p10 = scmp.ge.s32.totalorder %s20_s17, 4   ;;  %s4219_s13 = smov %s2965_s14 }
 0x3a0   : > { %s4220_s14 = smov %s3064_s25  ;;  %s4221_s15 = smov %s2973_s16 }
 0x3a1   : > { %s4222_s16 = smov %s4224_s20  ;;  %19 = sbr.rel (!%p17_p10) target bundleno = 6 (0x6), region = 83 }
 0x3a8   :  { %2328 = vsyncpa [#allocation4], 1 }
 0x3a9   :  { %2330 = vsyncpa [#allocation4 + $0x1], 1 }
 0x3aa   :  { %2331 = vsyncpa [#allocation6], 1 }
 0x3ab   :  { %2333 = vsyncpa [#allocation6 + $0x1], 1 }

</bundles_post_ra>
